<compile_context>
chip_gen: v5e
topology: v5e:2x2
jax: 0.10.0
libtpu: 0.0.40
codegen_flags: <defaults>
</compile_context>

<pallas_src>
import jax
import jax.numpy as jnp
from jax.experimental import pallas as pl
from jax.experimental.pallas import tpu as pltpu

LEAKY_SLOPE = 0.01   # nn.LeakyReLU default negative_slope
L1_EPS = 1e-12       # F.normalize default eps

_TARGET_ROWS = 512   # 256-1024 rows per tile: good MXU fill + near-roofline DMAs
_MIN_GRID = 8        # enough sequential steps per TensorCore to hide DMA


def _leaky_relu(x):
    return jnp.where(x >= 0, x, LEAKY_SLOPE * x)


# --------------------------------------------------------------------------- #
# Kernel
# --------------------------------------------------------------------------- #
def node_update_kernel(mask_ref, edge_ref, node_ref, w0a_ref, w0b_ref, w1_ref,
                       out_ref, aggr_ref):
    # mask_ref : (TB*N, N) f32  resident, tiled (1 - eye(N))
    # edge_ref : (TB*N, N) f32  node_ref : (TB*N, D) f32
    # w0a/w0b  : (D, H) bf16    w1_ref   : (H, O) bf16
    # out_ref  : (TB*N, O)      aggr_ref : (TB*N, D) f32 scratch
    rows, n = edge_ref.shape
    tb = rows // n

    # ---- edge preprocessing on the lane-dense 2-D view, exact f32:
    #      zero diagonal + L1 row-normalize (matches F.normalize(p=1)) ----
    e = edge_ref[...] * mask_ref[...]                               # (rows, n)
    denom = jnp.maximum(jnp.sum(jnp.abs(e), axis=-1, keepdims=True), L1_EPS)
    e = e / denom                                                   # f32, exact

    x32 = node_ref[...]                                             # (rows, D) f32
    x_bf = x32.astype(jnp.bfloat16)

    # ---- aggregation: one (N,N)@(N,D) MXU matmul per (b,c) pair, stored
    #      immediately into the 8-sublane-aligned f32 scratch (bounded live
    #      ranges; static f32 slices are tile-aligned for N % 8 == 0) ----
    for b in range(tb):                                             # static unroll
        r0 = b * n
        aggr_ref[pl.ds(r0, n), :] = jnp.dot(
            e[r0:r0 + n, :].astype(jnp.bfloat16),
            x32[r0:r0 + n, :].astype(jnp.bfloat16),
            preferred_element_type=jnp.float32)

    aggr_bf = aggr_ref[...].astype(jnp.bfloat16)                    # (rows, D)

    # ---- conv0 (split weight, no concat) + LeakyReLU: full-tile-row matmuls ----
    h = (jnp.dot(x_bf, w0a_ref[...], preferred_element_type=jnp.float32)
         + jnp.dot(aggr_bf, w0b_ref[...], preferred_element_type=jnp.float32))
    h = _leaky_relu(h).astype(jnp.bfloat16)                         # (rows, H)

    # ---- conv1 + LeakyReLU ----
    y = _leaky_relu(jnp.dot(h, w1_ref[...],
                            preferred_element_type=jnp.float32))    # (rows, O)
    out_ref[...] = y.astype(out_ref.dtype)


# --------------------------------------------------------------------------- #
# Tile sizing (per-generation)
# --------------------------------------------------------------------------- #
def _vmem_limit_bytes():
    try:
        cap = int(pltpu.get_tpu_info().vmem_capacity_bytes)
    except Exception:
        cap = 64 * 1024 * 1024            # v7x physical size; conservative fallback
    return min(cap * 3 // 4, 100 * 1024 * 1024)   # ~48 MiB on v7x, ~96 MiB on v5e/v6e


def _vmem_estimate_bytes(tb, n, d, h, o):
    """Rough per-step VMEM working set for a tile of tb (b, c) pairs."""
    rows = tb * n
    f32, bf16 = 4, 2
    tiles = 2 * rows * (n + d + o) * f32            # edge/node/out tiles, double-buffered
    mask = 2 * rows * n * f32                       # resident mask (2 pipeline buffers)
    weights = 2 * (2 * d * h + h * o) * bf16        # resident weights (2 pipeline buffers)
    scratch = rows * d * f32                        # aggregation scratch
    live = rows * (n + 2 * d + h) * bf16 + rows * (n + h) * f32
    return tiles + mask + weights + scratch + live


def _choose_tb(bc, n, d, h, o, budget_bytes):
    aligned = [tb for tb in range(1, bc + 1)
               if bc % tb == 0 and (tb == bc or (tb * n) % 8 == 0)]
    fitting = [tb for tb in aligned
               if _vmem_estimate_bytes(tb, n, d, h, o) <= budget_bytes]
    if not fitting:
        fitting = [min(aligned)]

    def score(tb):
        rows, grid = tb * n, bc // tb
        # 1) as many rows as possible up to the target (per-step amortization +
        #    MXU row fill), 2) keep >= _MIN_GRID steps for pipelining/megacore
        #    when possible, 3) prefer tiles closest to the target size.
        return (min(rows, _TARGET_ROWS), grid >= _MIN_GRID, -abs(rows - _TARGET_ROWS))

    return max(fitting, key=score)


# --------------------------------------------------------------------------- #
# Wrapper
# --------------------------------------------------------------------------- #
def node_update_network(node_feat, edge_feat, w0, w1, *, tb=None):
    """node_feat: (B, C, N, D) f32; edge_feat: (B, C, N, N) f32.
    w0: (hidden, 2*D) conv0 weight (1x1, squeezed); w1: (out_dim, hidden).
    Returns (B, C, N, out_dim)."""
    B, C, N, D = node_feat.shape
    hidden = w0.shape[0]
    out_dim = w1.shape[0]
    assert w0.shape == (hidden, 2 * D)
    assert w1.shape == (out_dim, hidden)
    assert edge_feat.shape == (B, C, N, N)

    bc = B * C
    vmem_limit = _vmem_limit_bytes()
    if tb is None:
        tb = _choose_tb(bc, N, D, hidden, out_dim, budget_bytes=vmem_limit * 7 // 10)
    assert bc % tb == 0 and (tb == bc or (tb * N) % 8 == 0), "invalid tb override"
    grid = bc // tb
    rows = tb * N

    # Free reshapes; activations stay f32 in HBM and are cast inside the kernel.
    edge_flat = edge_feat.reshape(bc * N, N)
    node_flat = node_feat.reshape(bc * N, D)

    # conv0 input channels are cat(node, aggr): split the pre-transposed bf16
    # weight so the concat never materializes in-kernel.
    w0a_t = jnp.transpose(w0[:, :D]).astype(jnp.bfloat16)            # (D, hidden)
    w0b_t = jnp.transpose(w0[:, D:]).astype(jnp.bfloat16)            # (D, hidden)
    w1_t = jnp.transpose(w1).astype(jnp.bfloat16)                    # (hidden, out)

    # Resident (1 - eye(N)) mask, pre-tiled to the (rows, N) tile layout.
    diag_mask = jnp.tile(1.0 - jnp.eye(N, dtype=jnp.float32), (tb, 1))

    out = pl.pallas_call(
        node_update_kernel,
        out_shape=jax.ShapeDtypeStruct((bc * N, out_dim), node_feat.dtype),
        grid_spec=pltpu.PrefetchScalarGridSpec(
            num_scalar_prefetch=0,
            grid=(grid,),
            in_specs=[
                pl.BlockSpec((rows, N), lambda g: (0, 0)),            # diag mask (resident)
                pl.BlockSpec((rows, N), lambda g: (g, 0)),            # edge tile (f32)
                pl.BlockSpec((rows, D), lambda g: (g, 0)),            # node tile (f32)
                pl.BlockSpec((D, hidden), lambda g: (0, 0)),          # W0a^T (resident)
                pl.BlockSpec((D, hidden), lambda g: (0, 0)),          # W0b^T (resident)
                pl.BlockSpec((hidden, out_dim), lambda g: (0, 0)),    # W1^T (resident)
            ],
            out_specs=pl.BlockSpec((rows, out_dim), lambda g: (g, 0)),
            scratch_shapes=[pltpu.VMEM((rows, D), jnp.float32)],
        ),
        compiler_params=pltpu.CompilerParams(
            dimension_semantics=("parallel",),     # independent (b,c) tiles
            vmem_limit_bytes=vmem_limit,
        ),
    )(diag_mask, edge_flat, node_flat, w0a_t, w0b_t, w1_t)

    return out.reshape(B, C, N, out_dim)


# --------------------------------------------------------------------------- #
# Pure-JAX reference (f32 replica of the PyTorch forward, 4-D branch)
# --------------------------------------------------------------------------- #
def reference_forward(node_feat, edge_feat, w0, w1):
    B, C, N, D = node_feat.shape
    eye = jnp.eye(N, dtype=node_feat.dtype)
    diag_mask = 1.0 - eye[None, None]
    e = edge_feat * diag_mask
    e = e / jnp.maximum(jnp.sum(jnp.abs(e), -1, keepdims=True), L1_EPS)
    e = e.reshape(-1, N, N)
    x = node_feat.reshape(-1, N, D)
    aggr = jnp.einsum('bij,bjd->bid', e, x)
    cat = jnp.concatenate([x, aggr], -1)                  # (BC, N, 2D)
    h = _leaky_relu(jnp.einsum('bnd,od->bno', cat, w0))   # conv0
    y = _leaky_relu(jnp.einsum('bnh,oh->bno', h, w1))     # conv1
    return y.reshape(B, C, N, -1)


# TODO(synk): BatchNorm2d / Dropout2d branches of the module (disabled in the
# default config batch_norm=False, dropout=0.0) are not implemented in-kernel.

if __name__ == "__main__":
    # Small shapes consistent with the module: out_dim == inp_dim == D so the
    # PyTorch final reshape back to (B, C, N, D) is valid.  bc = 16.
    B, C, N, D = 2, 8, 8, 32
    inp_dim = D
    out_dim = D
    hidden = out_dim * 2              # num_dims_list[0] = out_dim * 2 (n_layer=2)

    key = jax.random.PRNGKey(0)
    k1, k2, k3, k4 = jax.random.split(key, 4)
    node_feat = jax.random.normal(k1, (B, C, N, D), dtype=jnp.float32)
    edge_feat = jax.random.uniform(k2, (B, C, N, N), dtype=jnp.float32)

    # Deterministic parameter init (Conv2d weights, kernel_size=1, bias=False).
    w0 = (jax.random.normal(k3, (hidden, 2 * inp_dim), dtype=jnp.float32)
          * (1.0 / jnp.sqrt(2.0 * inp_dim)))
    w1 = (jax.random.normal(k4, (out_dim, hidden), dtype=jnp.float32)
          * (1.0 / jnp.sqrt(float(hidden))))

    out = node_update_network(node_feat, edge_feat, w0, w1)
    out = jax.block_until_ready(out)

    ref = reference_forward(node_feat, edge_feat, w0, w1)
    assert out.shape == (B, C, N, out_dim)
    # bf16 MXU operands -> relaxed tolerance vs the f32 reference.
    assert jnp.allclose(out, ref, atol=3e-2, rtol=3e-2), "mismatch vs reference"

    print("KERNEL_OK")
</pallas_src>

<mosaic_0001>
module attributes {stable_mosaic.version = 11 : i64} {
  func.func @node_update_kernel(%arg0: i32, %arg1: memref<128x8xf32, #tpu.memory_space<vmem>>, %arg2: memref<128x8xf32, #tpu.memory_space<vmem>>, %arg3: memref<128x32xf32, #tpu.memory_space<vmem>>, %arg4: memref<32x64xbf16, #tpu.memory_space<vmem>>, %arg5: memref<32x64xbf16, #tpu.memory_space<vmem>>, %arg6: memref<64x32xbf16, #tpu.memory_space<vmem>>, %arg7: memref<128x32xf32, #tpu.memory_space<vmem>>, %arg8: memref<128x32xf32, #tpu.memory_space<vmem>>) attributes {dimension_semantics = [#tpu.dimension_semantics<parallel>], iteration_bounds = array<i64: 1>, scalar_prefetch = 0 : i64, scratch_operands = 1 : i64, tpu.core_type = #tpu.core_type<tc>, window_params = [{pipeline_mode = #tpu.pipeline_mode<synchronous>, transform_indices = @transform_0, window_bounds = array<i64: 128, 8>}, {transform_indices = @transform_1, window_bounds = array<i64: 128, 8>}, {transform_indices = @transform_2, window_bounds = array<i64: 128, 32>}, {pipeline_mode = #tpu.pipeline_mode<synchronous>, transform_indices = @transform_3, window_bounds = array<i64: 32, 64>}, {pipeline_mode = #tpu.pipeline_mode<synchronous>, transform_indices = @transform_4, window_bounds = array<i64: 32, 64>}, {pipeline_mode = #tpu.pipeline_mode<synchronous>, transform_indices = @transform_5, window_bounds = array<i64: 64, 32>}, {transform_indices = @transform_6, window_bounds = array<i64: 128, 32>}]} {
    %c0 = arith.constant 0 : index
    %c0_0 = arith.constant 0 : index
    %0 = vector.load %arg2[%c0, %c0_0] : memref<128x8xf32, #tpu.memory_space<vmem>>, vector<128x8xf32>
    %c0_1 = arith.constant 0 : index
    %c0_2 = arith.constant 0 : index
    %1 = vector.load %arg1[%c0_1, %c0_2] : memref<128x8xf32, #tpu.memory_space<vmem>>, vector<128x8xf32>
    %2 = arith.mulf %0, %1 : vector<128x8xf32>
    %3 = math.absf %2 : vector<128x8xf32>
    %cst = arith.constant dense<0.000000e+00> : vector<128xf32>
    %4 = vector.multi_reduction <add>, %3, %cst [1] : vector<128x8xf32> to vector<128xf32>
    %5 = vector.shape_cast %4 : vector<128xf32> to vector<128x1xf32>
    %cst_3 = arith.constant 9.99999996E-13 : f32
    %6 = vector.broadcast %cst_3 : f32 to vector<128x1xf32>
    %7 = arith.maximumf %5, %6 : vector<128x1xf32>
    %8 = vector.broadcast %7 : vector<128x1xf32> to vector<128x8xf32>
    %9 = arith.divf %2, %8 : vector<128x8xf32>
    %c0_4 = arith.constant 0 : index
    %c0_5 = arith.constant 0 : index
    %10 = vector.load %arg3[%c0_4, %c0_5] : memref<128x32xf32, #tpu.memory_space<vmem>>, vector<128x32xf32>
    %11 = arith.truncf %10 : vector<128x32xf32> to vector<128x32xbf16>
    %12 = vector.extract_strided_slice %9 {offsets = [0, 0], sizes = [8, 8], strides = [1, 1]} : vector<128x8xf32> to vector<8x8xf32>
    %13 = arith.truncf %12 : vector<8x8xf32> to vector<8x8xbf16>
    %14 = vector.extract_strided_slice %10 {offsets = [0, 0], sizes = [8, 32], strides = [1, 1]} : vector<128x32xf32> to vector<8x32xf32>
    %15 = arith.truncf %14 : vector<8x32xf32> to vector<8x32xbf16>
    %cst_6 = arith.constant dense<0.000000e+00> : vector<8x32xf32>
    %16 = tpu.matmul %13, %15, %cst_6 {dimension_numbers = #tpu.dot_dimension_numbers<[1], [0], [0], [1], [0, 0, 1, 1], [], []>} : vector<8x8xbf16>, vector<8x32xbf16>, vector<8x32xf32> -> vector<8x32xf32>
    %c0_7 = arith.constant 0 : index
    %c0_8 = arith.constant 0 : index
    %17 = vector.load %arg8[%c0_7, %c0_8] : memref<128x32xf32, #tpu.memory_space<vmem>>, vector<8x32xf32>
    tpu.vector_store %arg8[%c0_7, %c0_8], %16 {strides = array<i32>} : memref<128x32xf32, #tpu.memory_space<vmem>>, vector<8x32xf32>,
    %18 = vector.extract_strided_slice %9 {offsets = [8, 0], sizes = [8, 8], strides = [1, 1]} : vector<128x8xf32> to vector<8x8xf32>
    %19 = arith.truncf %18 : vector<8x8xf32> to vector<8x8xbf16>
    %20 = vector.extract_strided_slice %10 {offsets = [8, 0], sizes = [8, 32], strides = [1, 1]} : vector<128x32xf32> to vector<8x32xf32>
    %21 = arith.truncf %20 : vector<8x32xf32> to vector<8x32xbf16>
    %cst_9 = arith.constant dense<0.000000e+00> : vector<8x32xf32>
    %22 = tpu.matmul %19, %21, %cst_9 {dimension_numbers = #tpu.dot_dimension_numbers<[1], [0], [0], [1], [0, 0, 1, 1], [], []>} : vector<8x8xbf16>, vector<8x32xbf16>, vector<8x32xf32> -> vector<8x32xf32>
    %c8 = arith.constant 8 : index
    %c0_10 = arith.constant 0 : index
    %23 = vector.load %arg8[%c8, %c0_10] : memref<128x32xf32, #tpu.memory_space<vmem>>, vector<8x32xf32>
    tpu.vector_store %arg8[%c8, %c0_10], %22 {strides = array<i32>} : memref<128x32xf32, #tpu.memory_space<vmem>>, vector<8x32xf32>,
    %24 = vector.extract_strided_slice %9 {offsets = [16, 0], sizes = [8, 8], strides = [1, 1]} : vector<128x8xf32> to vector<8x8xf32>
    %25 = arith.truncf %24 : vector<8x8xf32> to vector<8x8xbf16>
    %26 = vector.extract_strided_slice %10 {offsets = [16, 0], sizes = [8, 32], strides = [1, 1]} : vector<128x32xf32> to vector<8x32xf32>
    %27 = arith.truncf %26 : vector<8x32xf32> to vector<8x32xbf16>
    %cst_11 = arith.constant dense<0.000000e+00> : vector<8x32xf32>
    %28 = tpu.matmul %25, %27, %cst_11 {dimension_numbers = #tpu.dot_dimension_numbers<[1], [0], [0], [1], [0, 0, 1, 1], [], []>} : vector<8x8xbf16>, vector<8x32xbf16>, vector<8x32xf32> -> vector<8x32xf32>
    %c16 = arith.constant 16 : index
    %c0_12 = arith.constant 0 : index
    %29 = vector.load %arg8[%c16, %c0_12] : memref<128x32xf32, #tpu.memory_space<vmem>>, vector<8x32xf32>
    tpu.vector_store %arg8[%c16, %c0_12], %28 {strides = array<i32>} : memref<128x32xf32, #tpu.memory_space<vmem>>, vector<8x32xf32>,
    %30 = vector.extract_strided_slice %9 {offsets = [24, 0], sizes = [8, 8], strides = [1, 1]} : vector<128x8xf32> to vector<8x8xf32>
    %31 = arith.truncf %30 : vector<8x8xf32> to vector<8x8xbf16>
    %32 = vector.extract_strided_slice %10 {offsets = [24, 0], sizes = [8, 32], strides = [1, 1]} : vector<128x32xf32> to vector<8x32xf32>
    %33 = arith.truncf %32 : vector<8x32xf32> to vector<8x32xbf16>
    %cst_13 = arith.constant dense<0.000000e+00> : vector<8x32xf32>
    %34 = tpu.matmul %31, %33, %cst_13 {dimension_numbers = #tpu.dot_dimension_numbers<[1], [0], [0], [1], [0, 0, 1, 1], [], []>} : vector<8x8xbf16>, vector<8x32xbf16>, vector<8x32xf32> -> vector<8x32xf32>
    %c24 = arith.constant 24 : index
    %c0_14 = arith.constant 0 : index
    %35 = vector.load %arg8[%c24, %c0_14] : memref<128x32xf32, #tpu.memory_space<vmem>>, vector<8x32xf32>
    tpu.vector_store %arg8[%c24, %c0_14], %34 {strides = array<i32>} : memref<128x32xf32, #tpu.memory_space<vmem>>, vector<8x32xf32>,
    %36 = vector.extract_strided_slice %9 {offsets = [32, 0], sizes = [8, 8], strides = [1, 1]} : vector<128x8xf32> to vector<8x8xf32>
    %37 = arith.truncf %36 : vector<8x8xf32> to vector<8x8xbf16>
    %38 = vector.extract_strided_slice %10 {offsets = [32, 0], sizes = [8, 32], strides = [1, 1]} : vector<128x32xf32> to vector<8x32xf32>
    %39 = arith.truncf %38 : vector<8x32xf32> to vector<8x32xbf16>
    %cst_15 = arith.constant dense<0.000000e+00> : vector<8x32xf32>
    %40 = tpu.matmul %37, %39, %cst_15 {dimension_numbers = #tpu.dot_dimension_numbers<[1], [0], [0], [1], [0, 0, 1, 1], [], []>} : vector<8x8xbf16>, vector<8x32xbf16>, vector<8x32xf32> -> vector<8x32xf32>
    %c32 = arith.constant 32 : index
    %c0_16 = arith.constant 0 : index
    %41 = vector.load %arg8[%c32, %c0_16] : memref<128x32xf32, #tpu.memory_space<vmem>>, vector<8x32xf32>
    tpu.vector_store %arg8[%c32, %c0_16], %40 {strides = array<i32>} : memref<128x32xf32, #tpu.memory_space<vmem>>, vector<8x32xf32>,
    %42 = vector.extract_strided_slice %9 {offsets = [40, 0], sizes = [8, 8], strides = [1, 1]} : vector<128x8xf32> to vector<8x8xf32>
    %43 = arith.truncf %42 : vector<8x8xf32> to vector<8x8xbf16>
    %44 = vector.extract_strided_slice %10 {offsets = [40, 0], sizes = [8, 32], strides = [1, 1]} : vector<128x32xf32> to vector<8x32xf32>
    %45 = arith.truncf %44 : vector<8x32xf32> to vector<8x32xbf16>
    %cst_17 = arith.constant dense<0.000000e+00> : vector<8x32xf32>
    %46 = tpu.matmul %43, %45, %cst_17 {dimension_numbers = #tpu.dot_dimension_numbers<[1], [0], [0], [1], [0, 0, 1, 1], [], []>} : vector<8x8xbf16>, vector<8x32xbf16>, vector<8x32xf32> -> vector<8x32xf32>
    %c40 = arith.constant 40 : index
    %c0_18 = arith.constant 0 : index
    %47 = vector.load %arg8[%c40, %c0_18] : memref<128x32xf32, #tpu.memory_space<vmem>>, vector<8x32xf32>
    tpu.vector_store %arg8[%c40, %c0_18], %46 {strides = array<i32>} : memref<128x32xf32, #tpu.memory_space<vmem>>, vector<8x32xf32>,
    %48 = vector.extract_strided_slice %9 {offsets = [48, 0], sizes = [8, 8], strides = [1, 1]} : vector<128x8xf32> to vector<8x8xf32>
    %49 = arith.truncf %48 : vector<8x8xf32> to vector<8x8xbf16>
    %50 = vector.extract_strided_slice %10 {offsets = [48, 0], sizes = [8, 32], strides = [1, 1]} : vector<128x32xf32> to vector<8x32xf32>
    %51 = arith.truncf %50 : vector<8x32xf32> to vector<8x32xbf16>
    %cst_19 = arith.constant dense<0.000000e+00> : vector<8x32xf32>
    %52 = tpu.matmul %49, %51, %cst_19 {dimension_numbers = #tpu.dot_dimension_numbers<[1], [0], [0], [1], [0, 0, 1, 1], [], []>} : vector<8x8xbf16>, vector<8x32xbf16>, vector<8x32xf32> -> vector<8x32xf32>
    %c48 = arith.constant 48 : index
    %c0_20 = arith.constant 0 : index
    %53 = vector.load %arg8[%c48, %c0_20] : memref<128x32xf32, #tpu.memory_space<vmem>>, vector<8x32xf32>
    tpu.vector_store %arg8[%c48, %c0_20], %52 {strides = array<i32>} : memref<128x32xf32, #tpu.memory_space<vmem>>, vector<8x32xf32>,
    %54 = vector.extract_strided_slice %9 {offsets = [56, 0], sizes = [8, 8], strides = [1, 1]} : vector<128x8xf32> to vector<8x8xf32>
    %55 = arith.truncf %54 : vector<8x8xf32> to vector<8x8xbf16>
    %56 = vector.extract_strided_slice %10 {offsets = [56, 0], sizes = [8, 32], strides = [1, 1]} : vector<128x32xf32> to vector<8x32xf32>
    %57 = arith.truncf %56 : vector<8x32xf32> to vector<8x32xbf16>
    %cst_21 = arith.constant dense<0.000000e+00> : vector<8x32xf32>
    %58 = tpu.matmul %55, %57, %cst_21 {dimension_numbers = #tpu.dot_dimension_numbers<[1], [0], [0], [1], [0, 0, 1, 1], [], []>} : vector<8x8xbf16>, vector<8x32xbf16>, vector<8x32xf32> -> vector<8x32xf32>
    %c56 = arith.constant 56 : index
    %c0_22 = arith.constant 0 : index
    %59 = vector.load %arg8[%c56, %c0_22] : memref<128x32xf32, #tpu.memory_space<vmem>>, vector<8x32xf32>
    tpu.vector_store %arg8[%c56, %c0_22], %58 {strides = array<i32>} : memref<128x32xf32, #tpu.memory_space<vmem>>, vector<8x32xf32>,
    %60 = vector.extract_strided_slice %9 {offsets = [64, 0], sizes = [8, 8], strides = [1, 1]} : vector<128x8xf32> to vector<8x8xf32>
    %61 = arith.truncf %60 : vector<8x8xf32> to vector<8x8xbf16>
    %62 = vector.extract_strided_slice %10 {offsets = [64, 0], sizes = [8, 32], strides = [1, 1]} : vector<128x32xf32> to vector<8x32xf32>
    %63 = arith.truncf %62 : vector<8x32xf32> to vector<8x32xbf16>
    %cst_23 = arith.constant dense<0.000000e+00> : vector<8x32xf32>
    %64 = tpu.matmul %61, %63, %cst_23 {dimension_numbers = #tpu.dot_dimension_numbers<[1], [0], [0], [1], [0, 0, 1, 1], [], []>} : vector<8x8xbf16>, vector<8x32xbf16>, vector<8x32xf32> -> vector<8x32xf32>
    %c64 = arith.constant 64 : index
    %c0_24 = arith.constant 0 : index
    %65 = vector.load %arg8[%c64, %c0_24] : memref<128x32xf32, #tpu.memory_space<vmem>>, vector<8x32xf32>
    tpu.vector_store %arg8[%c64, %c0_24], %64 {strides = array<i32>} : memref<128x32xf32, #tpu.memory_space<vmem>>, vector<8x32xf32>,
    %66 = vector.extract_strided_slice %9 {offsets = [72, 0], sizes = [8, 8], strides = [1, 1]} : vector<128x8xf32> to vector<8x8xf32>
    %67 = arith.truncf %66 : vector<8x8xf32> to vector<8x8xbf16>
    %68 = vector.extract_strided_slice %10 {offsets = [72, 0], sizes = [8, 32], strides = [1, 1]} : vector<128x32xf32> to vector<8x32xf32>
    %69 = arith.truncf %68 : vector<8x32xf32> to vector<8x32xbf16>
    %cst_25 = arith.constant dense<0.000000e+00> : vector<8x32xf32>
    %70 = tpu.matmul %67, %69, %cst_25 {dimension_numbers = #tpu.dot_dimension_numbers<[1], [0], [0], [1], [0, 0, 1, 1], [], []>} : vector<8x8xbf16>, vector<8x32xbf16>, vector<8x32xf32> -> vector<8x32xf32>
    %c72 = arith.constant 72 : index
    %c0_26 = arith.constant 0 : index
    %71 = vector.load %arg8[%c72, %c0_26] : memref<128x32xf32, #tpu.memory_space<vmem>>, vector<8x32xf32>
    tpu.vector_store %arg8[%c72, %c0_26], %70 {strides = array<i32>} : memref<128x32xf32, #tpu.memory_space<vmem>>, vector<8x32xf32>,
    %72 = vector.extract_strided_slice %9 {offsets = [80, 0], sizes = [8, 8], strides = [1, 1]} : vector<128x8xf32> to vector<8x8xf32>
    %73 = arith.truncf %72 : vector<8x8xf32> to vector<8x8xbf16>
    %74 = vector.extract_strided_slice %10 {offsets = [80, 0], sizes = [8, 32], strides = [1, 1]} : vector<128x32xf32> to vector<8x32xf32>
    %75 = arith.truncf %74 : vector<8x32xf32> to vector<8x32xbf16>
    %cst_27 = arith.constant dense<0.000000e+00> : vector<8x32xf32>
    %76 = tpu.matmul %73, %75, %cst_27 {dimension_numbers = #tpu.dot_dimension_numbers<[1], [0], [0], [1], [0, 0, 1, 1], [], []>} : vector<8x8xbf16>, vector<8x32xbf16>, vector<8x32xf32> -> vector<8x32xf32>
    %c80 = arith.constant 80 : index
    %c0_28 = arith.constant 0 : index
    %77 = vector.load %arg8[%c80, %c0_28] : memref<128x32xf32, #tpu.memory_space<vmem>>, vector<8x32xf32>
    tpu.vector_store %arg8[%c80, %c0_28], %76 {strides = array<i32>} : memref<128x32xf32, #tpu.memory_space<vmem>>, vector<8x32xf32>,
    %78 = vector.extract_strided_slice %9 {offsets = [88, 0], sizes = [8, 8], strides = [1, 1]} : vector<128x8xf32> to vector<8x8xf32>
    %79 = arith.truncf %78 : vector<8x8xf32> to vector<8x8xbf16>
    %80 = vector.extract_strided_slice %10 {offsets = [88, 0], sizes = [8, 32], strides = [1, 1]} : vector<128x32xf32> to vector<8x32xf32>
    %81 = arith.truncf %80 : vector<8x32xf32> to vector<8x32xbf16>
    %cst_29 = arith.constant dense<0.000000e+00> : vector<8x32xf32>
    %82 = tpu.matmul %79, %81, %cst_29 {dimension_numbers = #tpu.dot_dimension_numbers<[1], [0], [0], [1], [0, 0, 1, 1], [], []>} : vector<8x8xbf16>, vector<8x32xbf16>, vector<8x32xf32> -> vector<8x32xf32>
    %c88 = arith.constant 88 : index
    %c0_30 = arith.constant 0 : index
    %83 = vector.load %arg8[%c88, %c0_30] : memref<128x32xf32, #tpu.memory_space<vmem>>, vector<8x32xf32>
    tpu.vector_store %arg8[%c88, %c0_30], %82 {strides = array<i32>} : memref<128x32xf32, #tpu.memory_space<vmem>>, vector<8x32xf32>,
    %84 = vector.extract_strided_slice %9 {offsets = [96, 0], sizes = [8, 8], strides = [1, 1]} : vector<128x8xf32> to vector<8x8xf32>
    %85 = arith.truncf %84 : vector<8x8xf32> to vector<8x8xbf16>
    %86 = vector.extract_strided_slice %10 {offsets = [96, 0], sizes = [8, 32], strides = [1, 1]} : vector<128x32xf32> to vector<8x32xf32>
    %87 = arith.truncf %86 : vector<8x32xf32> to vector<8x32xbf16>
    %cst_31 = arith.constant dense<0.000000e+00> : vector<8x32xf32>
    %88 = tpu.matmul %85, %87, %cst_31 {dimension_numbers = #tpu.dot_dimension_numbers<[1], [0], [0], [1], [0, 0, 1, 1], [], []>} : vector<8x8xbf16>, vector<8x32xbf16>, vector<8x32xf32> -> vector<8x32xf32>
    %c96 = arith.constant 96 : index
    %c0_32 = arith.constant 0 : index
    %89 = vector.load %arg8[%c96, %c0_32] : memref<128x32xf32, #tpu.memory_space<vmem>>, vector<8x32xf32>
    tpu.vector_store %arg8[%c96, %c0_32], %88 {strides = array<i32>} : memref<128x32xf32, #tpu.memory_space<vmem>>, vector<8x32xf32>,
    %90 = vector.extract_strided_slice %9 {offsets = [104, 0], sizes = [8, 8], strides = [1, 1]} : vector<128x8xf32> to vector<8x8xf32>
    %91 = arith.truncf %90 : vector<8x8xf32> to vector<8x8xbf16>
    %92 = vector.extract_strided_slice %10 {offsets = [104, 0], sizes = [8, 32], strides = [1, 1]} : vector<128x32xf32> to vector<8x32xf32>
    %93 = arith.truncf %92 : vector<8x32xf32> to vector<8x32xbf16>
    %cst_33 = arith.constant dense<0.000000e+00> : vector<8x32xf32>
    %94 = tpu.matmul %91, %93, %cst_33 {dimension_numbers = #tpu.dot_dimension_numbers<[1], [0], [0], [1], [0, 0, 1, 1], [], []>} : vector<8x8xbf16>, vector<8x32xbf16>, vector<8x32xf32> -> vector<8x32xf32>
    %c104 = arith.constant 104 : index
    %c0_34 = arith.constant 0 : index
    %95 = vector.load %arg8[%c104, %c0_34] : memref<128x32xf32, #tpu.memory_space<vmem>>, vector<8x32xf32>
    tpu.vector_store %arg8[%c104, %c0_34], %94 {strides = array<i32>} : memref<128x32xf32, #tpu.memory_space<vmem>>, vector<8x32xf32>,
    %96 = vector.extract_strided_slice %9 {offsets = [112, 0], sizes = [8, 8], strides = [1, 1]} : vector<128x8xf32> to vector<8x8xf32>
    %97 = arith.truncf %96 : vector<8x8xf32> to vector<8x8xbf16>
    %98 = vector.extract_strided_slice %10 {offsets = [112, 0], sizes = [8, 32], strides = [1, 1]} : vector<128x32xf32> to vector<8x32xf32>
    %99 = arith.truncf %98 : vector<8x32xf32> to vector<8x32xbf16>
    %cst_35 = arith.constant dense<0.000000e+00> : vector<8x32xf32>
    %100 = tpu.matmul %97, %99, %cst_35 {dimension_numbers = #tpu.dot_dimension_numbers<[1], [0], [0], [1], [0, 0, 1, 1], [], []>} : vector<8x8xbf16>, vector<8x32xbf16>, vector<8x32xf32> -> vector<8x32xf32>
    %c112 = arith.constant 112 : index
    %c0_36 = arith.constant 0 : index
    %101 = vector.load %arg8[%c112, %c0_36] : memref<128x32xf32, #tpu.memory_space<vmem>>, vector<8x32xf32>
    tpu.vector_store %arg8[%c112, %c0_36], %100 {strides = array<i32>} : memref<128x32xf32, #tpu.memory_space<vmem>>, vector<8x32xf32>,
    %102 = vector.extract_strided_slice %9 {offsets = [120, 0], sizes = [8, 8], strides = [1, 1]} : vector<128x8xf32> to vector<8x8xf32>
    %103 = arith.truncf %102 : vector<8x8xf32> to vector<8x8xbf16>
    %104 = vector.extract_strided_slice %10 {offsets = [120, 0], sizes = [8, 32], strides = [1, 1]} : vector<128x32xf32> to vector<8x32xf32>
    %105 = arith.truncf %104 : vector<8x32xf32> to vector<8x32xbf16>
    %cst_37 = arith.constant dense<0.000000e+00> : vector<8x32xf32>
    %106 = tpu.matmul %103, %105, %cst_37 {dimension_numbers = #tpu.dot_dimension_numbers<[1], [0], [0], [1], [0, 0, 1, 1], [], []>} : vector<8x8xbf16>, vector<8x32xbf16>, vector<8x32xf32> -> vector<8x32xf32>
    %c120 = arith.constant 120 : index
    %c0_38 = arith.constant 0 : index
    %107 = vector.load %arg8[%c120, %c0_38] : memref<128x32xf32, #tpu.memory_space<vmem>>, vector<8x32xf32>
    tpu.vector_store %arg8[%c120, %c0_38], %106 {strides = array<i32>} : memref<128x32xf32, #tpu.memory_space<vmem>>, vector<8x32xf32>,
    %c0_39 = arith.constant 0 : index
    %c0_40 = arith.constant 0 : index
    %108 = vector.load %arg8[%c0_39, %c0_40] : memref<128x32xf32, #tpu.memory_space<vmem>>, vector<128x32xf32>
    %109 = arith.truncf %108 : vector<128x32xf32> to vector<128x32xbf16>
    %c0_41 = arith.constant 0 : index
    %c0_42 = arith.constant 0 : index
    %110 = vector.load %arg4[%c0_41, %c0_42] : memref<32x64xbf16, #tpu.memory_space<vmem>>, vector<32x64xbf16>
    %cst_43 = arith.constant dense<0.000000e+00> : vector<128x64xf32>
    %111 = tpu.matmul %11, %110, %cst_43 {dimension_numbers = #tpu.dot_dimension_numbers<[1], [0], [0], [1], [0, 0, 1, 1], [], []>} : vector<128x32xbf16>, vector<32x64xbf16>, vector<128x64xf32> -> vector<128x64xf32>
    %c0_44 = arith.constant 0 : index
    %c0_45 = arith.constant 0 : index
    %112 = vector.load %arg5[%c0_44, %c0_45] : memref<32x64xbf16, #tpu.memory_space<vmem>>, vector<32x64xbf16>
    %cst_46 = arith.constant dense<0.000000e+00> : vector<128x64xf32>
    %113 = tpu.matmul %109, %112, %cst_46 {dimension_numbers = #tpu.dot_dimension_numbers<[1], [0], [0], [1], [0, 0, 1, 1], [], []>} : vector<128x32xbf16>, vector<32x64xbf16>, vector<128x64xf32> -> vector<128x64xf32>
    %114 = arith.addf %111, %113 : vector<128x64xf32>
    %cst_47 = arith.constant 0.000000e+00 : f32
    %115 = vector.broadcast %cst_47 : f32 to vector<128x64xf32>
    %116 = arith.cmpf oge, %114, %115 : vector<128x64xf32>
    %cst_48 = arith.constant 0.00999999977 : f32
    %117 = vector.broadcast %cst_48 : f32 to vector<128x64xf32>
    %118 = arith.mulf %117, %114 : vector<128x64xf32>
    %119 = arith.select %116, %114, %118 : vector<128x64xi1>, vector<128x64xf32>
    %120 = arith.truncf %119 : vector<128x64xf32> to vector<128x64xbf16>
    %c0_49 = arith.constant 0 : index
    %c0_50 = arith.constant 0 : index
    %121 = vector.load %arg6[%c0_49, %c0_50] : memref<64x32xbf16, #tpu.memory_space<vmem>>, vector<64x32xbf16>
    %cst_51 = arith.constant dense<0.000000e+00> : vector<128x32xf32>
    %122 = tpu.matmul %120, %121, %cst_51 {dimension_numbers = #tpu.dot_dimension_numbers<[1], [0], [0], [1], [0, 0, 1, 1], [], []>} : vector<128x64xbf16>, vector<64x32xbf16>, vector<128x32xf32> -> vector<128x32xf32>
    %cst_52 = arith.constant 0.000000e+00 : f32
    %123 = vector.broadcast %cst_52 : f32 to vector<128x32xf32>
    %124 = arith.cmpf oge, %122, %123 : vector<128x32xf32>
    %cst_53 = arith.constant 0.00999999977 : f32
    %125 = vector.broadcast %cst_53 : f32 to vector<128x32xf32>
    %126 = arith.mulf %125, %122 : vector<128x32xf32>
    %127 = arith.select %124, %122, %126 : vector<128x32xi1>, vector<128x32xf32>
    %c0_54 = arith.constant 0 : index
    %c0_55 = arith.constant 0 : index
    %128 = vector.load %arg7[%c0_54, %c0_55] : memref<128x32xf32, #tpu.memory_space<vmem>>, vector<128x32xf32>
    tpu.vector_store %arg7[%c0_54, %c0_55], %127 {strides = array<i32>} : memref<128x32xf32, #tpu.memory_space<vmem>>, vector<128x32xf32>,
    return
  }
  func.func @transform_0(%arg0: i32) -> (i32, i32) {
    %c0_i32 = arith.constant 0 : i32
    %c0_i32_0 = arith.constant 0 : i32
    %c0_i32_1 = arith.constant 0 : i32
    return %c0_i32, %c0_i32_0 : i32, i32
  }
  func.func @transform_1(%arg0: i32) -> (i32, i32) {
    %c0_i32 = arith.constant 0 : i32
    %c0_i32_0 = arith.constant 0 : i32
    return %arg0, %c0_i32 : i32, i32
  }
  func.func @transform_2(%arg0: i32) -> (i32, i32) {
    %c0_i32 = arith.constant 0 : i32
    %c0_i32_0 = arith.constant 0 : i32
    return %arg0, %c0_i32 : i32, i32
  }
  func.func @transform_3(%arg0: i32) -> (i32, i32) {
    %c0_i32 = arith.constant 0 : i32
    %c0_i32_0 = arith.constant 0 : i32
    %c0_i32_1 = arith.constant 0 : i32
    return %c0_i32, %c0_i32_0 : i32, i32
  }
  func.func @transform_4(%arg0: i32) -> (i32, i32) {
    %c0_i32 = arith.constant 0 : i32
    %c0_i32_0 = arith.constant 0 : i32
    %c0_i32_1 = arith.constant 0 : i32
    return %c0_i32, %c0_i32_0 : i32, i32
  }
  func.func @transform_5(%arg0: i32) -> (i32, i32) {
    %c0_i32 = arith.constant 0 : i32
    %c0_i32_0 = arith.constant 0 : i32
    %c0_i32_1 = arith.constant 0 : i32
    return %c0_i32, %c0_i32_0 : i32, i32
  }
  func.func @transform_6(%arg0: i32) -> (i32, i32) {
    %c0_i32 = arith.constant 0 : i32
    %c0_i32_0 = arith.constant 0 : i32
    return %arg0, %c0_i32 : i32, i32
  }
}

</mosaic_0001>

<bundles_post_ra>
// kernel: tpu_custom_call.1
= control target key start
LH: loop header
LB: loop body
LE: loop exit
PB: predicated region body
PF: predicated region fallthrough
CT: control target
= control target key end

     0   :  { %vm88_vm0 = vcmask 64512   ;;  %vm422_vm1 = vcmask 1043456   ;;  %s2168_s0 = inlined_call_operand.vmem [shape: f32[128,8], index: 0, kind: input, shape index: {}]   ;;  %s2169_s1 = inlined_call_operand.vmem [shape: f32[128,8], index: 1, kind: input, shape index: {}]   ;;  %s2170_s2 = inlined_call_operand.vmem [shape: f32[128,32], index: 2, kind: input, shape index: {}]   ;;  %s2171_s4 = inlined_call_operand.vmem [shape: bf16[32,64], index: 4, kind: input, shape index: {}]   ;;  %s2172_s3 = inlined_call_operand.vmem [shape: bf16[32,64], index: 3, kind: input, shape index: {}]   ;;  %s2173_s5 = inlined_call_operand.vmem [shape: bf16[64,32], index: 5, kind: input, shape index: {}]   ;;  %s2174_s6 = inlined_call_operand.vmem [shape: f32[128,32], index: 6, kind: output, shape index: {}]  }
   0x1   :  { %v26_v0 = vld [vmem:[%s2169_s1 + $0x10] sm:$0xff]  ;;  %v24_v2 = vld [vmem:[%s2169_s1] sm:$0xff]  ;;  %v27_v9 = vld [vmem:[%s2169_s1 + $0x18] sm:$0xff] }
   0x2   :  { %v42_v1 = vld [vmem:[%s2168_s0 + $0x10] sm:$0xff]  ;;  %v40_v4 = vld [vmem:[%s2168_s0] sm:$0xff]  ;;  %v43_v10 = vld [vmem:[%s2168_s0 + $0x18] sm:$0xff] }
   0x3   :  { %v1367_v3 = vmul.f32 %v42_v1, %v26_v0  ;;  %v28_v5 = vld [vmem:[%s2169_s1 + $0x20] sm:$0xff]  ;;  %v1378_v7 = vmul.f32 %v40_v4, %v24_v2  ;;  %v25_v11 = vld [vmem:[%s2169_s1 + $0x8] sm:$0xff]  ;;  %v1392_v13 = vmul.f32 %v43_v10, %v27_v9  ;;  %v30_v25 = vld [vmem:[%s2169_s1 + $0x30] sm:$0xff] }
   0x4   :  { %v44_v6 = vld [vmem:[%s2168_s0 + $0x20] sm:$0xff]  ;;  %v41_v14 = vld [vmem:[%s2168_s0 + $0x8] sm:$0xff]  ;;  %v46_v26 = vld [vmem:[%s2168_s0 + $0x30] sm:$0xff] }
   0x5   :  { %v1380_v8 = vmul.f32 %v44_v6, %v28_v5  ;;  %v74_v12 = vand.u32 2147483647, %v1367_v3  ;;  %v29_v15 = vld [vmem:[%s2169_s1 + $0x28] sm:$0xff]  ;;  %v72_v17 = vand.u32 2147483647, %v1378_v7  ;;  %v1405_v19 = vmul.f32 %v41_v14, %v25_v11  ;;  %v31_v29 = vld [vmem:[%s2169_s1 + $0x38] sm:$0xff] }
   0x6   :  { %v45_v16 = vld [vmem:[%s2168_s0 + $0x28] sm:$0xff]  ;;  %v75_v24 = vand.u32 2147483647, %v1392_v13  ;;  %v47_v30 = vld [vmem:[%s2168_s0 + $0x38] sm:$0xff]  ;;  %v32_v31 = vld [vmem:[%s2169_s1 + $0x40] sm:$0xff]  ;;  %v1434_v34 = vmul.f32 %v46_v26, %v30_v25 }
   0x7   :  { %v76_v18 = vand.u32 2147483647, %v1380_v8  ;;  %v1407_v20 = vmul.f32 %v45_v16, %v29_v15  ;;  %v95_v21 = vsel %vm88_vm0, %v74_v12, 0.0  ;;  %v89_v22 = vsel %vm88_vm0, %v72_v17, 0.0  ;;  %v48_v32 = vld [vmem:[%s2168_s0 + $0x40] sm:$0xff]  ;;  %v33_v42 = vld [vmem:[%s2169_s1 + $0x48] sm:$0xff] }
   0x8   :  { %96 = vadd.xlane.f32.xlu1 %v95_v21  ;;  %90 = vadd.xlane.f32.xlu0 %v89_v22  ;;  %v73_v27 = vand.u32 2147483647, %v1405_v19  ;;  %v98_v33 = vsel %vm88_vm0, %v75_v24, 0.0  ;;  %v1436_v35 = vmul.f32 %v47_v30, %v31_v29  ;;  %v1440_v38 = vmul.f32 %v48_v32, %v32_v31  ;;  %v34_v43 = vld [vmem:[%s2169_s1 + $0x50] sm:$0xff]  ;;  %v49_v45 = vld [vmem:[%s2168_s0 + $0x48] sm:$0xff]  ;;  %v35_v46 = vld [vmem:[%s2169_s1 + $0x58] sm:$0xff] }
   0x9   :  { %v101_v23 = vsel %vm88_vm0, %v76_v18, 0.0  ;;  %v77_v28 = vand.u32 2147483647, %v1407_v20  ;;  %v78_v39 = vand.u32 2147483647, %v1434_v34  ;;  %v50_v44 = vld [vmem:[%s2168_s0 + $0x50] sm:$0xff]  ;;  %v1468_v52 = vmul.f32 %v49_v45, %v33_v42 }
   0xa   :  { %102 = vadd.xlane.f32.xlu2 %v101_v23  ;;  %v92_v36 = vsel %vm88_vm0, %v73_v27, 0.0  ;;  %v79_v40 = vand.u32 2147483647, %v1436_v35  ;;  %v80_v41 = vand.u32 2147483647, %v1440_v38  ;;  %v51_v47 = vld [vmem:[%s2168_s0 + $0x58] sm:$0xff]  ;;  %v1464_v49 = vmul.f32 %v50_v44, %v34_v43 }
   0xb   :  { %v104_v37 = vsel %vm88_vm0, %v77_v28, 0.0  ;;  %v107_v50 = vsel %vm88_vm0, %v78_v39, 0.0  ;;  %v1470_v53 = vmul.f32 %v51_v47, %v35_v46  ;;  %v37_v55 = vld [vmem:[%s2169_s1 + $0x68] sm:$0xff]  ;;  %v81_v56 = vand.u32 2147483647, %v1468_v52  ;;  %v36_v59 = vld [vmem:[%s2169_s1 + $0x60] sm:$0xff] }
   0xc   :  { %v110_v48 = vsel %vm88_vm0, %v79_v40, 0.0  ;;  %v113_v51 = vsel %vm88_vm0, %v80_v41, 0.0  ;;  %v82_v54 = vand.u32 2147483647, %v1464_v49  ;;  %v53_v58 = vld [vmem:[%s2168_s0 + $0x68] sm:$0xff]  ;;  %v52_v60 = vld [vmem:[%s2168_s0 + $0x60] sm:$0xff] }
   0xd   :  { %v83_v57 = vand.u32 2147483647, %v1470_v53  ;;  %v38_v61 = vld [vmem:[%s2169_s1 + $0x70] sm:$0xff]  ;;  %v1494_v0 = vmul.f32 %v53_v58, %v37_v55  ;;  %v116_v1 = vsel %vm88_vm0, %v81_v56, 0.0  ;;  %v1498_v4 = vmul.f32 %v52_v60, %v36_v59  ;;  %v39_v11 = vld [vmem:[%s2169_s1 + $0x78] sm:$0xff]  ;;  %v1521_v22 = vld [vmem:[%s2170_s2] sm:$0xff] }
   0xe   :  { %v54_v62 = vld [vmem:[%s2168_s0 + $0x70] sm:$0xff]  ;;  %v119_v63 = vsel %vm88_vm0, %v82_v54, 0.0  ;;  %v55_v12 = vld [vmem:[%s2168_s0 + $0x78] sm:$0xff]  ;;  %v418_v24 = vpack.c.bf16 %v1521_v22, %v1521_v22  ;;  %v1537_v28 = vld [vmem:[%s2170_s2 + $0x8] sm:$0xff] }
   0xf   :  { %v122_v2 = vsel %vm88_vm0, %v83_v57, 0.0  ;;  %v1500_v5 = vmul.f32 %v54_v62, %v38_v61  ;;  %v85_v6 = vand.u32 2147483647, %v1494_v0  ;;  %v84_v9 = vand.u32 2147483647, %v1498_v4  ;;  %v1526_v23 = vld [vmem:[%s2170_s2 + $0x10] sm:$0xff] }
  0x10   :  { %99 = vadd.xlane.f32.xlu1 %v98_v33  ;;  %93 = vadd.xlane.f32.xlu0 %v92_v36  ;;  %v1514_v17 = vmul.f32 %v55_v12, %v39_v11  ;;  %v464_v25 = vpack.c.bf16 %v1526_v23, %v1526_v23  ;;  %v424_v26 = vsel %vm422_vm1, %v418_v24, 0  ;;  %v1542_v29 = vld [vmem:[%s2170_s2 + $0x18] sm:$0xff]  ;;  %v442_v30 = vpack.c.bf16 %v1537_v28, %v1537_v28  ;;  %v1553_v42 = vld [vmem:[%s2170_s2 + $0x20] sm:$0xff]  ;;  %v1572_v59 = vld [vmem:[%s2170_s2 + $0x28] sm:$0xff] }
  0x11   :  { %v86_v10 = vand.u32 2147483647, %v1500_v5  ;;  %v128_v14 = vsel %vm88_vm0, %v85_v6, 0.0  ;;  %v125_v15 = vsel %vm88_vm0, %v84_v9, 0.0  ;;  %433 = vmatpush.bf16.msra.mxu0 %v424_v26  ;;  %v486_v31 = vpack.c.bf16 %v1542_v29, %v1542_v29 }
  0x12   :  { %105 = vadd.xlane.f32.xlu2 %v104_v37  ;;  %v87_v18 = vand.u32 2147483647, %v1514_v17  ;;  %v469_v27 = vsel %vm422_vm1, %v464_v25, 0  ;;  %v447_v32 = vsel %vm422_vm1, %v442_v30, 0  ;;  %v508_v43 = vpack.c.bf16 %v1553_v42, %v1553_v42 }
  0x13   :  { %v131_v16 = vsel %vm88_vm0, %v86_v10, 0.0  ;;  %478 = vmatpush.bf16.msra.mxu2 %v469_v27  ;;  %v491_v33 = vsel %vm422_vm1, %v486_v31, 0  ;;  %456 = vmatpush.bf16.msra.mxu1 %v447_v32 }
  0x14   :  { %v134_v21 = vsel %vm88_vm0, %v87_v18, 0.0  ;;  %500 = vmatpush.bf16.msra.mxu3 %v491_v33  ;;  %v513_v45 = vsel %vm422_vm1, %v508_v43, 0 }
  0x15   :  { %522 = vmatpush.bf16.msrb.mxu0 %v513_v45 }
  0x18   :  { %111 = vadd.xlane.f32.xlu1 %v110_v48  ;;  %108 = vadd.xlane.f32.xlu0 %v107_v50  ;;  %v409_v50 = vpack.c.bf16 %v1537_v28, %v1521_v22 }
  0x1a   :  { %114 = vadd.xlane.f32.xlu2 %v113_v51  ;;  %v410_v51 = vpack.c.bf16 %v1542_v29, %v1526_v23  ;;  %v411_v29 = vpack.c.bf16 %v1572_v59, %v1553_v42 }
  0x20   :  { %120 = vadd.xlane.f32.xlu1 %v119_v63  ;;  %117 = vadd.xlane.f32.xlu0 %v116_v1  ;;  %v530_v1 = vpack.c.bf16 %v1572_v59, %v1572_v59 }
  0x22   :  { %123 = vadd.xlane.f32.xlu2 %v122_v2 }
  0x28   :  { %129 = vadd.xlane.f32.xlu1 %v128_v14  ;;  %126 = vadd.xlane.f32.xlu0 %v125_v15  ;;  %v535_v14 = vsel %vm422_vm1, %v530_v1, 0 }
  0x29   :  { %544 = vmatpush.bf16.msrb.mxu1 %v535_v14 }
  0x2a   :  { %132 = vadd.xlane.f32.xlu2 %v131_v16 }
  0x30   :  { %135 = vadd.xlane.f32.xlu0 %v134_v21 }
  0x7b   :  { %v97_v36 = vpop.xlane.xlu1 %96  ;;  %v91_v39 = vpop.xlane.xlu0 %90 }
  0x7c   :  { %v139_v37 = vmax.f32 %v97_v36, 1e-12  ;;  %v137_v40 = vmax.f32 %v91_v39, 1e-12 }
  0x7d   :  { %v103_v41 = vpop.xlane.xlu2 %102 }
  0x7e   :  { %1291 = vrcp.f32 %v139_v37  ;;  %v1564_v56 = vmax.f32 %v103_v41, 1e-12  ;;  %vm188_vm2 = vweird.f32 %v139_v37  ;;  %v192_v6 = vand.u32 2147483647, %v139_v37 }
  0x7f   :  { %1293 = vrcp.f32 %v137_v40  ;;  %v194_v9 = vand.u32 2147483648, %v139_v37  ;;  %v164_v11 = vand.u32 2147483648, %v137_v40  ;;  %v162_v21 = vand.u32 2147483647, %v137_v40 }
  0x80   :  { %vm158_vm6 = vweird.f32 %v137_v40  ;;  %vm193_vm7 = vcmp.eq.f32.partialorder %v192_v6, 8.507059e+37  ;;  %vm218_vm12 = vweird.f32 %v1564_v56  ;;  %v222_v14 = vand.u32 2147483647, %v1564_v56 }
  0x81   :  { %v195_v32 = vor.u32 1.1754944e-38, %v194_v9  ;;  %v165_v39 = vor.u32 1.1754944e-38, %v164_v11  ;;  %vm163_vm9 = vcmp.eq.f32.partialorder %v162_v21, 8.507059e+37 }
  0x83   :  { %v100_v44 = vpop.xlane.xlu1 %99  ;;  %v94_v48 = vpop.xlane.xlu0 %93 }
  0x84   :  { %v1292_v46 = vpop.eup %1291  ;;  %v1558_v47 = vmax.f32 %v100_v44, 1e-12  ;;  %v1566_v57 = vmax.f32 %v94_v48, 1e-12 }
  0x85   :  { %v1294_v54 = vpop.eup %1293  ;;  %v184_v55 = vmul.f32 %v1292_v46, %v139_v37  ;;  %v106_v62 = vpop.xlane.xlu2 %105  ;;  %vm189_vm3 = vweird.f32 %v1292_v46 }
  0x86   :  { %v154_v58 = vmul.f32 %v1294_v54, %v137_v40  ;;  %1295 = vrcp.f32 %v1558_v47  ;;  %vm159_vm4 = vweird.f32 %v1294_v54  ;;  %vm1582_vm5 = vmor %vm188_vm2, %vm189_vm3  ;;  %v1590_v27 = vmax.f32 %v106_v62, 1e-12 }
  0x87   :  { %v185_v60 = vsub.f32 1.0, %v184_v55  ;;  %1297 = vrcp.f32 %v1566_v57  ;;  %vm160_vm8 = vmor %vm158_vm6, %vm159_vm4  ;;  %v207_v1 = vand.u32 2147483647, %v1558_v47  ;;  %vm203_vm10 = vweird.f32 %v1558_v47 }
  0x88   :  { %v155_v61 = vsub.f32 1.0, %v154_v58  ;;  %1299 = vrcp.f32 %v1564_v56  ;;  %vm173_vm2 = vweird.f32 %v1566_v57  ;;  %vm1653_vm3 = vcmp.eq.f32.partialorder %v222_v14, 8.507059e+37 }
  0x89   :  { %v186_v63 = vmul.f32 %v1292_v46, %v185_v60  ;;  %vm208_vm14 = vcmp.eq.f32.partialorder %v207_v1, 8.507059e+37 }
  0x8a   :  { %v156_v2 = vmul.f32 %v1294_v54, %v155_v61 }
  0x8b   :  { %v112_v10 = vpop.xlane.xlu1 %111  ;;  %v187_v12 = vadd.f32 %v1292_v46, %v186_v63  ;;  %v109_v16 = vpop.xlane.xlu0 %108 }
  0x8c   :  { %v1579_v15 = vpop.eup %1295  ;;  %v157_v18 = vadd.f32 %v1294_v54, %v156_v2  ;;  %v1592_v30 = vmax.f32 %v109_v16, 1e-12  ;;  %v1607_v58 = vmax.f32 %v112_v10, 1e-12 }
  0x8d   :  { %v1586_v25 = vpop.eup %1297  ;;  %v199_v26 = vmul.f32 %v1579_v15, %v1558_v47  ;;  %v191_v31 = vsel %vm1582_vm5, %v1292_v46, %v187_v12  ;;  %v115_v45 = vpop.xlane.xlu2 %114  ;;  %vm204_vm11 = vweird.f32 %v1579_v15  ;;  %v224_v12 = vand.u32 2147483648, %v1564_v56 }
  0x8e   :  { %v1596_v33 = vpop.eup %1299  ;;  %v169_v37 = vmul.f32 %v1586_v25, %v1566_v57  ;;  %1301 = vrcp.f32 %v1592_v30  ;;  %v161_v41 = vsel %vm160_vm8, %v1294_v54, %v157_v18  ;;  %v196_v43 = vsel %vm193_vm7, %v195_v32, %v191_v31  ;;  %vm205_vm13 = vmor %vm203_vm10, %vm204_vm11  ;;  %v1641_v32 = vld [vmem:[%s2170_s2 + $0x30] sm:$0xff] }
  0x8f   :  { %v200_v36 = vsub.f32 1.0, %v199_v26  ;;  %1303 = vrcp.f32 %v1590_v27  ;;  %v166_v44 = vsel %vm163_vm9, %v165_v39, %v161_v41  ;;  %v197_v40 = vmul.f32 %v196_v43, %v1367_v3 }
  0x90   :  { %v214_v46 = vmul.f32 %v1596_v33, %v1564_v56  ;;  %v167_v48 = vmul.f32 %v166_v44, %v1378_v7  ;;  %v170_v55 = vsub.f32 1.0, %v169_v37  ;;  %v1610_v63 = vmax.f32 %v115_v45, 1e-12 }
  0x91   :  { %v463_v60 = vpack.c.bf16 %v197_v40, %v197_v40  ;;  %v201_v61 = vmul.f32 %v1579_v15, %v200_v36  ;;  %v209_v3 = vand.u32 2147483648, %v1558_v47  ;;  %1305 = vrcp.f32 %v1607_v58 }
  0x92   :  { %v417_v62 = vpack.c.bf16 %v167_v48, %v167_v48  ;;  %v171_v47 = vmul.f32 %v1586_v25, %v170_v55  ;;  %v215_v16 = vsub.f32 1.0, %v214_v46  ;;  %1307 = vrcp.f32 %v1610_v63 }
  0x93   :  { %v121_v54 = vpop.xlane.xlu1 %120  ;;  %1205 = vmatmul.msk.bf16.vlgmr.msra.gmra.mxu2 %vm88_vm0, %v463_v60  ;;  %v202_v7 = vadd.f32 %v1579_v15, %v201_v61  ;;  %v118_v9 = vpop.xlane.xlu0 %117  ;;  %v210_v18 = vor.u32 1.1754944e-38, %v209_v3  ;;  %v177_v26 = vand.u32 2147483647, %v1566_v57  ;;  %v179_v31 = vand.u32 2147483648, %v1566_v57 }
  0x94   :  { %v1614_v2 = vpop.eup %1301  ;;  %1203 = vmatmul.msk.bf16.vlgmr.msra.gmra.mxu0 %vm88_vm0, %v417_v62  ;;  %v1623_v10 = vmax.f32 %v121_v54, 1e-12  ;;  %v1633_v21 = vmax.f32 %v118_v9, 1e-12  ;;  %vm174_vm15 = vweird.f32 %v1586_v25  ;;  %v225_v43 = vor.u32 1.1754944e-38, %v224_v12 }
  0x95   :  { %v244_v6 = vmul.f32 %v1614_v2, %v1592_v30  ;;  %v1625_v11 = vpop.eup %1303  ;;  %v206_v24 = vsel %vm205_vm13, %v1579_v15, %v202_v7  ;;  %v172_v15 = vadd.f32 %v1586_v25, %v171_v47  ;;  %v239_v44 = vand.u32 2147483648, %v1590_v27  ;;  %v124_v45 = vpop.xlane.xlu2 %123  ;;  %vm175_vm4 = vmor %vm173_vm2, %vm174_vm15 }
  0x96   :  { %v229_v36 = vmul.f32 %v1625_v11, %v1590_v27  ;;  %v211_v39 = vsel %vm208_vm14, %v210_v18, %v206_v24  ;;  %1309 = vrcp.f32 %v1623_v10  ;;  %v552_v40 = vpack.c.bf16 %v1641_v32, %v1641_v32 }
  0x97   :  { %v245_v37 = vsub.f32 1.0, %v244_v6  ;;  %v212_v41 = vmul.f32 %v211_v39, %v1392_v13  ;;  %v1657_v48 = vpop.eup %1305  ;;  %v216_v13 = vmul.f32 %v1596_v33, %v215_v16  ;;  %1311 = vrcp.f32 %v1633_v21 }
  0x98   :  { %v180_v60 = vor.u32 1.1754944e-38, %v179_v31  ;;  %v1661_v61 = vpop.eup %1307  ;;  %v230_v57 = vsub.f32 1.0, %v229_v36  ;;  %v176_v62 = vsel %vm175_vm4, %v1586_v25, %v172_v15  ;;  %vm178_vm5 = vcmp.eq.f32.partialorder %v177_v26, 8.507059e+37  ;;  %v1691_v36 = vld [vmem:[%s2170_s2 + $0x38] sm:$0xff] }
  0x99   :  { %v485_v55 = vpack.c.bf16 %v212_v41, %v212_v41  ;;  %v246_v54 = vmul.f32 %v1614_v2, %v245_v37  ;;  %v269_v1 = vand.u32 2147483648, %v1607_v58  ;;  %v557_v7 = vsel %vm422_vm1, %v552_v40, 0 }
  0x9a   :  { %v181_v3 = vsel %vm178_vm5, %v180_v60, %v176_v62  ;;  %v1668_v6 = vmax.f32 %v124_v45, 1e-12  ;;  %vm248_vm6 = vweird.f32 %v1592_v30  ;;  %v254_v12 = vand.u32 2147483648, %v1592_v30  ;;  %566 = vmatpush.bf16.msrb.mxu2 %v557_v7 }
  0x9b   :  { %1206 = vmatmul.msk.bf16.vlgmr.msra.gmra.mxu3 %vm88_vm0, %v485_v55  ;;  %v259_v47 = vmul.f32 %v1657_v48, %v1607_v58  ;;  %v182_v25 = vmul.f32 %v181_v3, %v1405_v19  ;;  %v274_v14 = vmul.f32 %v1661_v61, %v1610_v63  ;;  %v282_v16 = vand.u32 2147483647, %v1610_v63  ;;  %v127_v56 = vpop.xlane.xlu0 %126 }
  0x9c   :  { %v1670_v9 = vpop.eup %1309  ;;  %v217_v18 = vadd.f32 %v1596_v33, %v216_v13  ;;  %vm219_vm7 = vweird.f32 %v1596_v33  ;;  %v231_v24 = vmul.f32 %v1625_v11, %v230_v57  ;;  %vm233_vm8 = vweird.f32 %v1590_v27 }
  0x9d   :  { %v284_v26 = vand.u32 2147483648, %v1610_v63  ;;  %v441_v31 = vpack.c.bf16 %v182_v25, %v182_v25  ;;  %vm220_vm9 = vmor %vm218_vm12, %vm219_vm7  ;;  %v247_v19 = vadd.f32 %v1614_v2, %v246_v54  ;;  %v1693_v37 = vpop.eup %1311  ;;  %v304_v39 = vmul.f32 %v1670_v9, %v1623_v10  ;;  %v133_v25 = vpop.xlane.xlu2 %132 }
  0x9e   :  { %1313 = vrcp.f32 %v1668_v6  ;;  %v221_v41 = vsel %vm220_vm9, %v1596_v33, %v217_v18  ;;  %vm249_vm10 = vweird.f32 %v1614_v2  ;;  %v260_v15 = vsub.f32 1.0, %v259_v47 }
  0x9f   :  { %1204 = vmatmul.msk.bf16.vlgmr.msra.gmra.mxu1 %vm88_vm0, %v441_v31  ;;  %v226_v40 = vsel %vm1653_vm3, %v225_v43, %v221_v41  ;;  %vm250_vm11 = vmor %vm248_vm6, %vm249_vm10  ;;  %v252_v45 = vand.u32 2147483647, %v1592_v30  ;;  %v255_v13 = vor.u32 1.1754944e-38, %v254_v12  ;;  %v275_v55 = vsub.f32 1.0, %v274_v14 }
  0xa0   :  { %v227_v60 = vmul.f32 %v226_v40, %v1380_v8  ;;  %v251_v33 = vsel %vm250_vm11, %v1614_v2, %v247_v19  ;;  %v574_v57 = vpack.c.bf16 %v1691_v36, %v1691_v36  ;;  %v289_v54 = vmul.f32 %v1693_v37, %v1633_v21 }
  0xa1   :  { %v299_v46 = vand.u32 2147483648, %v1633_v21  ;;  %vm253_vm12 = vcmp.eq.f32.partialorder %v252_v45, 8.507059e+37  ;;  %v1713_v43 = vmax.f32 %v127_v56, 1e-12  ;;  %vm263_vm13 = vweird.f32 %v1607_v58  ;;  %v130_v56 = vpop.xlane.xlu1 %129 }
  0xa2   :  { %v305_v30 = vsub.f32 1.0, %v304_v39  ;;  %v507_v62 = vpack.c.bf16 %v227_v60, %v227_v60  ;;  %v256_v3 = vsel %vm253_vm12, %v255_v13, %v251_v33  ;;  %v579_v8 = vsel %vm422_vm1, %v574_v57, 0 }
  0xa3   :  { %vm278_vm14 = vweird.f32 %v1610_v63  ;;  %v1718_v2 = vor.u32 1.1754944e-38, %v284_v26  ;;  %v297_v7 = vand.u32 2147483647, %v1633_v21  ;;  %v312_v12 = vand.u32 2147483647, %v1623_v10  ;;  %588 = vmatpush.bf16.msrb.mxu3 %v579_v8 }
  0xa4   :  { %v257_v47 = vmul.f32 %v256_v3, %v1434_v34  ;;  %v1723_v14 = vpop.eup %1313  ;;  %v276_v18 = vmul.f32 %v1661_v61, %v275_v55  ;;  %vm279_vm15 = vweird.f32 %v1661_v61  ;;  %vm308_vm2 = vweird.f32 %v1623_v10  ;;  %1207 = vmatmul.msk.bf16.vlgmr.msrb.gmra.mxu0 %vm88_vm0, %v507_v62  ;;  %v1778_v62 = vld [vmem:[%s2170_s2 + $0x40] sm:$0xff] }
  0xa5   :  { %v314_v31 = vand.u32 2147483648, %v1623_v10  ;;  %1315 = vrcp.f32 %v1713_v43  ;;  %v261_v26 = vmul.f32 %v1657_v48, %v260_v15  ;;  %v290_v19 = vsub.f32 1.0, %v289_v54 }
  0xa6   :  { %v1732_v34 = vor.u32 1.1754944e-38, %v299_v46  ;;  %v551_v39 = vpack.c.bf16 %v257_v47, %v257_v47  ;;  %v306_v41 = vmul.f32 %v1670_v9, %v305_v30  ;;  %vm309_vm3 = vweird.f32 %v1670_v9 }
  0xa7   :  { %v1736_v40 = vmax.f32 %v133_v25, 1e-12  ;;  %v232_v45 = vadd.f32 %v1625_v11, %v231_v24  ;;  %v319_v13 = vmul.f32 %v1723_v14, %v1668_v6  ;;  %v329_v55 = vand.u32 2147483648, %v1668_v6 }
  0xa8   :  { %1209 = vmatmul.msk.bf16.vlgmr.msrb.gmra.mxu2 %vm88_vm0, %v551_v39  ;;  %vm234_vm4 = vweird.f32 %v1625_v11  ;;  %v237_v15 = vand.u32 2147483647, %v1590_v27  ;;  %v1746_v60 = vadd.f32 %v1661_v61, %v276_v18  ;;  %vm1750_vm5 = vcmp.eq.f32.partialorder %v282_v16, 8.507059e+37  ;;  %v1801_v27 = vld [vmem:[%s2170_s2 + $0x50] sm:$0xff] }
  0xa9   :  { %vm293_vm6 = vweird.f32 %v1633_v21  ;;  %vm294_vm7 = vweird.f32 %v1693_v37  ;;  %vm1756_vm9 = vcmp.eq.f32.partialorder %v312_v12, 8.507059e+37  ;;  %v1760_v57 = vor.u32 1.1754944e-38, %v314_v31  ;;  %vm1765_vm10 = vmor %vm233_vm8, %vm234_vm4 }
  0xaa   :  { %1317 = vrcp.f32 %v1736_v40  ;;  %v291_v16 = vmul.f32 %v1693_v37, %v290_v19  ;;  %v1770_v46 = vmax.f32 %v130_v56, 1e-12  ;;  %v236_v30 = vsel %vm1765_vm10, %v1625_v11, %v232_v45  ;;  %v1791_v11 = vld [vmem:[%s2170_s2 + $0x48] sm:$0xff]  ;;  %vm1827_vm10 = vmor %vm278_vm14, %vm279_vm15 }
  0xab   :  { %vm238_vm11 = vcmp.eq.f32.partialorder %v237_v15, 8.507059e+37  ;;  %v1780_v3 = vpop.eup %1315  ;;  %v307_v8 = vadd.f32 %v1670_v9, %v306_v41  ;;  %vm323_vm8 = vweird.f32 %v1668_v6  ;;  %v327_v12 = vand.u32 2147483647, %v1668_v6  ;;  %vm1845_vm14 = vmor %vm308_vm2, %vm309_vm3 }
  0xac   :  { %v240_v47 = vor.u32 1.1754944e-38, %v239_v44  ;;  %v262_v25 = vadd.f32 %v1657_v48, %v261_v26  ;;  %v320_v18 = vsub.f32 1.0, %v319_v13  ;;  %v1793_v31 = vor.u32 1.1754944e-38, %v329_v55 }
  0xad   :  { %v334_v19 = vmul.f32 %v1780_v3, %v1713_v43  ;;  %vm264_vm12 = vweird.f32 %v1657_v48  ;;  %v267_v26 = vand.u32 2147483647, %v1607_v58  ;;  %v270_v39 = vor.u32 1.1754944e-38, %v269_v1 }
  0xae   :  { %v241_v44 = vsel %vm238_vm11, %v240_v47, %v236_v30  ;;  %v596_v41 = vpack.c.bf16 %v1778_v62, %v1778_v62  ;;  %v1809_v56 = vadd.f32 %v1693_v37, %v291_v16  ;;  %1319 = vrcp.f32 %v1770_v46  ;;  %vm1815_vm4 = vmor %vm263_vm13, %vm264_vm12  ;;  %v136_v47 = vpop.xlane.xlu0 %135 }
  0xaf   :  { %v242_v45 = vmul.f32 %v241_v44, %v1407_v20  ;;  %v618_v55 = vpack.c.bf16 %v1791_v11, %v1791_v11  ;;  %vm1831_vm11 = vcmp.eq.f32.partialorder %v297_v7, 8.507059e+37  ;;  %v266_v58 = vsel %vm1815_vm4, %v1657_v48, %v262_v25  ;;  %v1856_v25 = vld [vmem:[%s2170_s2 + $0x58] sm:$0xff]  ;;  %vm1885_vm12 = vmor %vm293_vm6, %vm294_vm7  ;;  %v1276_v20 = vld [vmem:[%s2172_s3 + $0x8] sm:$0xff] }
  0xb0   :  { %v1821_v1 = vpop.eup %1317  ;;  %vm268_vm13 = vcmp.eq.f32.partialorder %v267_v26, 8.507059e+37  ;;  %v601_v54 = vsel %vm422_vm1, %v596_v41, 0  ;;  %v640_v16 = vpack.c.bf16 %v1801_v27, %v1801_v27  ;;  %v321_v7 = vmul.f32 %v1723_v14, %v320_v18 }
  0xb1   :  { %vm324_vm15 = vweird.f32 %v1723_v14  ;;  %v335_v30 = vsub.f32 1.0, %v334_v19  ;;  %v364_v48 = vmul.f32 %v1821_v1, %v1736_v40  ;;  %610 = vmatpush.bf16.msra.mxu0 %v601_v54  ;;  %v529_v10 = vpack.c.bf16 %v242_v45, %v242_v45 }
  0xb2   :  { %v271_v44 = vsel %vm268_vm13, %v270_v39, %v266_v58  ;;  %v623_v26 = vsel %vm422_vm1, %v618_v55, 0  ;;  %v645_v41 = vsel %vm422_vm1, %v640_v16, 0  ;;  %vm1860_vm2 = vcmp.eq.f32.partialorder %v327_v12, 8.507059e+37  ;;  %vm1904_vm7 = vmor %vm323_vm8, %vm324_vm15 }
  0xb3   :  { %vm338_vm3 = vweird.f32 %v1713_v43  ;;  %v344_v19 = vand.u32 2147483648, %v1713_v43  ;;  %v365_v13 = vsub.f32 1.0, %v364_v48  ;;  %v272_v54 = vmul.f32 %v271_v44, %v1436_v35  ;;  %632 = vmatpush.bf16.msra.mxu1 %v623_v26  ;;  %654 = vmatpush.bf16.msra.mxu2 %v645_v41 }
  0xb4   :  { %1208 = vmatmul.msk.bf16.vlgmr.msrb.gmra.mxu1 %vm88_vm0, %v529_v10  ;;  %v1868_v39 = vmax.f32 %v136_v47, 1e-12  ;;  %v281_v12 = vsel %vm1827_vm10, %v1661_v61, %v1746_v60  ;;  %v311_v45 = vsel %vm1845_vm14, %v1670_v9, %v307_v8  ;;  %v662_v55 = vpack.c.bf16 %v1856_v25, %v1856_v25  ;;  %v1879_v58 = vpop.eup %1319 }
  0xb5   :  { %v366_v15 = vmul.f32 %v1821_v1, %v365_v13  ;;  %v573_v61 = vpack.c.bf16 %v272_v54, %v272_v54  ;;  %v286_v9 = vsel %vm1750_vm5, %v1718_v2, %v281_v12  ;;  %v316_v60 = vsel %vm1756_vm9, %v1760_v57, %v311_v45  ;;  %v1916_v57 = vld [vmem:[%s2170_s2 + $0x60] sm:$0xff]  ;;  %v1967_v12 = vld [vmem:[%s2170_s2 + $0x78] sm:$0xff] }
  0xb6   :  { %v322_v8 = vadd.f32 %v1723_v14, %v321_v7  ;;  %v336_v16 = vmul.f32 %v1780_v3, %v335_v30  ;;  %vm368_vm6 = vweird.f32 %v1736_v40  ;;  %1321 = vrcp.f32 %v1868_v39  ;;  %v1934_v30 = vld [vmem:[%s2170_s2 + $0x70] sm:$0xff] }
  0xb7   :  { %vm369_vm5 = vweird.f32 %v1821_v1  ;;  %1210 = vmatmul.msk.bf16.vlgmr.msrb.gmra.mxu3 %vm88_vm0, %v573_v61  ;;  %v287_v2 = vmul.f32 %v286_v9, %v1440_v38  ;;  %v317_v33 = vmul.f32 %v316_v60, %v1464_v49  ;;  %v667_v24 = vsel %vm422_vm1, %v662_v55, 0  ;;  %v1929_v49 = vld [vmem:[%s2170_s2 + $0x68] sm:$0xff] }
  0xb8   :  { %v349_v6 = vmul.f32 %v1879_v58, %v1770_v46  ;;  %v372_v63 = vand.u32 2147483647, %v1736_v40  ;;  %v374_v7 = vand.u32 2147483648, %v1736_v40  ;;  %676 = vmatpush.bf16.msra.mxu3 %v667_v24  ;;  %v296_v38 = vsel %vm1885_vm12, %v1693_v37, %v1809_v56  ;;  %vm1943_vm8 = vmor %vm368_vm6, %vm369_vm5 }
  0xb9   :  { %vm339_vm9 = vweird.f32 %v1780_v3  ;;  %v367_v48 = vadd.f32 %v1821_v1, %v366_v15  ;;  %v595_v47 = vpack.c.bf16 %v287_v2, %v287_v2  ;;  %v639_v10 = vpack.c.bf16 %v317_v33, %v317_v33 }
  0xba   :  { %v337_v44 = vadd.f32 %v1780_v3, %v336_v16  ;;  %v326_v56 = vsel %vm1904_vm7, %v1723_v14, %v322_v8  ;;  %v684_v26 = vpack.c.bf16 %v1916_v57, %v1916_v57  ;;  %v415_v41 = vpack.c.bf16 %v1929_v49, %v1916_v57  ;;  %vm1973_vm4 = vmor %vm338_vm3, %vm339_vm9  ;;  %v1280_v57 = vld [vmem:[%s2173_s5 + $0x8] sm:$0xff] }
  0xbb   :  { %v342_v13 = vand.u32 2147483647, %v1713_v43  ;;  %1211 = vmatmul.msk.bf16.vlgmr.msra.gmra.mxu0 %vm88_vm0, %v595_v47  ;;  %1213 = vmatmul.msk.bf16.vlgmr.msra.gmra.mxu2 %vm88_vm0, %v639_v10  ;;  %v301_v40 = vsel %vm1831_vm11, %v1732_v34, %v296_v38  ;;  %v706_v54 = vpack.c.bf16 %v1929_v49, %v1929_v49  ;;  %v728_v14 = vpack.c.bf16 %v1934_v30, %v1934_v30  ;;  %v1279_v49 = vld [vmem:[%s2173_s5] sm:$0xff] }
  0xbc   :  { %v1322_v45 = vpop.eup %1321  ;;  %v350_v55 = vsub.f32 1.0, %v349_v6  ;;  %v345_v34 = vor.u32 1.1754944e-38, %v344_v19  ;;  %v375_v35 = vor.u32 1.1754944e-38, %v374_v7  ;;  %v689_v15 = vsel %vm422_vm1, %v684_v26, 0 }
  0xbd   :  { %v371_v61 = vsel %vm1943_vm8, %v1821_v1, %v367_v48  ;;  %vm373_vm10 = vcmp.eq.f32.partialorder %v372_v63, 8.507059e+37  ;;  %v379_v9 = vmul.f32 %v1322_v45, %v1868_v39  ;;  %698 = vmatpush.bf16.msrb.mxu0 %v689_v15  ;;  %v711_v60 = vsel %vm422_vm1, %v706_v54, 0 }
  0xbe   :  { %v302_v43 = vmul.f32 %v301_v40, %v1468_v52  ;;  %v331_v8 = vsel %vm1860_vm2, %v1793_v31, %v326_v56  ;;  %720 = vmatpush.bf16.msrb.mxu1 %v711_v60  ;;  %v733_v19 = vsel %vm422_vm1, %v728_v14, 0  ;;  %v750_v16 = vpack.c.bf16 %v1967_v12, %v1967_v12 }
  0xbf   :  { %vm343_vm11 = vcmp.eq.f32.partialorder %v342_v13, 8.507059e+37  ;;  %v380_v1 = vsub.f32 1.0, %v379_v9  ;;  %742 = vmatpush.bf16.msrb.mxu2 %v733_v19  ;;  %v341_v21 = vsel %vm1973_vm4, %v1780_v3, %v337_v44  ;;  %v351_v2 = vmul.f32 %v1879_v58, %v350_v55 }
  0xc0   :  { %v376_v52 = vsel %vm373_vm10, %v375_v35, %v371_v61  ;;  %v755_v33 = vsel %vm422_vm1, %v750_v16, 0  ;;  %v332_v31 = vmul.f32 %v331_v8, %v1470_v53  ;;  %vm353_vm13 = vweird.f32 %v1770_v46 }
  0xc1   :  { %764 = vmatpush.bf16.msrb.mxu3 %v755_v33  ;;  %vm354_vm14 = vweird.f32 %v1879_v58  ;;  %v617_v18 = vpack.c.bf16 %v302_v43, %v302_v43  ;;  %v346_v24 = vsel %vm343_vm11, %v345_v34, %v341_v21  ;;  %v359_v6 = vand.u32 2147483648, %v1770_v46 }
  0xc2   :  { %v381_v63 = vmul.f32 %v1322_v45, %v380_v1  ;;  %v377_v7 = vmul.f32 %v376_v52, %v1500_v5  ;;  %v352_v3 = vadd.f32 %v1879_v58, %v351_v2  ;;  %v357_v38 = vand.u32 2147483647, %v1770_v46  ;;  %vm2003_vm1 = vmor %vm353_vm13, %vm354_vm14 }
  0xc3   :  { %vm383_vm15 = vweird.f32 %v1868_v39  ;;  %vm384_vm2 = vweird.f32 %v1322_v45  ;;  %v661_v48 = vpack.c.bf16 %v332_v31, %v332_v31  ;;  %v347_v47 = vmul.f32 %v346_v24, %v1498_v4 }
  0xc4   :  { %1212 = vmatmul.msk.bf16.vlgmr.msra.gmra.mxu1 %vm88_vm0, %v617_v18  ;;  %v389_v10 = vand.u32 2147483648, %v1868_v39  ;;  %v360_v44 = vor.u32 1.1754944e-38, %v359_v6  ;;  %v382_v5 = vadd.f32 %v1322_v45, %v381_v63  ;;  %v387_v37 = vand.u32 2147483647, %v1868_v39  ;;  %vm385_vm12 = vmor %vm383_vm15, %vm384_vm2 }
  0xc5   :  { %v727_v46 = vpack.c.bf16 %v377_v7, %v377_v7  ;;  %v356_v56 = vsel %vm2003_vm1, %v1879_v58, %v352_v3  ;;  %vm358_vm3 = vcmp.eq.f32.partialorder %v357_v38, 8.507059e+37  ;;  %v683_v26 = vpack.c.bf16 %v347_v47, %v347_v47  ;;  %930 = vmatpush.bf16.msra.mxu1 %v1276_v20 }
  0xc6   :  { %v390_v13 = vor.u32 1.1754944e-38, %v389_v10  ;;  %v386_v40 = vsel %vm385_vm12, %v1322_v45, %v382_v5  ;;  %vm388_vm6 = vcmp.eq.f32.partialorder %v387_v37, 8.507059e+37  ;;  %v361_v4 = vsel %vm358_vm3, %v360_v44, %v356_v56  ;;  %v1278_v45 = vld [vmem:[%s2171_s4 + $0x8] sm:$0xff] }
  0xc7   :  { %1214 = vmatmul.msk.bf16.vlgmr.msra.gmra.mxu3 %vm88_vm0, %v661_v48  ;;  %v362_v39 = vmul.f32 %v361_v4, %v1494_v0  ;;  %845 = vmatpush.bf16.msra.mxu0 %v1278_v45  ;;  %v1277_v0 = vld [vmem:[%s2171_s4] sm:$0xff]  ;;  %v412_v42 = vpack.c.bf16 %v1691_v36, %v1641_v32  ;;  %v413_v36 = vpack.c.bf16 %v1791_v11, %v1778_v62  ;;  %vm1061_vm9 = vcmask 523264  }
  0xc8   :  { %v391_v54 = vsel %vm388_vm6, %v390_v13, %v386_v40  ;;  %1283 = vmatpush.bf16.msra.mxu3 %v1278_v45 }
  0xc9   :  { %v392_v14 = vmul.f32 %v391_v54, %v1514_v17  ;;  %v705_v55 = vpack.c.bf16 %v362_v39, %v362_v39  ;;  %v1275_v17 = vld [vmem:[%s2172_s3] sm:$0xff]  ;;  %v414_v54 = vpack.c.bf16 %v1856_v25, %v1801_v27  ;;  %v416_v25 = vpack.c.bf16 %v1967_v12, %v1934_v30 }
  0xca   :  { %931 = vmatpush.bf16.msra.mxu1 %v1275_v17 }
  0xcb   :  { %1215 = vmatmul.msk.bf16.vlgmr.msrb.gmra.mxu0 %vm88_vm0, %v683_v26  ;;  %1217 = vmatmul.msk.bf16.vlgmr.msrb.gmra.mxu2 %vm88_vm0, %v727_v46  ;;  %v749_v58 = vpack.c.bf16 %v392_v14, %v392_v14 }
  0xcc   :  { %846 = vmatpush.bf16.msra.mxu0 %v1277_v0  ;;  %1284 = vmatpush.bf16.msra.mxu3 %v1277_v0 }
  0xd4   :  { %1216 = vmatmul.msk.bf16.vlgmr.msrb.gmra.mxu1 %vm88_vm0, %v705_v55 }
  0xd7   :  { %1218 = vmatmul.msk.bf16.vlgmr.msrb.gmra.mxu3 %vm88_vm0, %v749_v58  ;;  %vm439_vm0 = vcmask 261120  }
  0xd8   :  { %1285 = vmatpush.bf16.msrb.mxu3 %v1276_v20 }
  0xdc   :  { %1286 = vmatpush.bf16.msrb.mxu3 %v1275_v17 }
  0xe4   :  { %1243 = vmatmul.msk.bf16.vlgmr.msra.gmra.mxu1 %vm439_vm0, %v409_v50 }
  0xf4   :  { %1244 = vmatmul.msk.bf16.gmra.mxu1 %vm439_vm0, %v410_v51 }
 0x104   :  { %1245 = vmatmul.msk.bf16.gmra.mxu1 %vm439_vm0, %v411_v29 }
 0x111   :  { %v435_v34 = vpop.f32.mrf.mxu0 }
 0x112   :  { %440 = vst.msk [vmem:[#allocation2] sm:$0xff] %vm439_vm0, %v435_v34 }
 0x114   :  { %1246 = vmatmul.msk.bf16.gmra.mxu1 %vm439_vm0, %v412_v42 }
 0x116   :  { %v480_v35 = vpop.f32.mrf.mxu2 }
 0x117   :  { %484 = vst.msk [vmem:[#allocation2 + $0x10] sm:$0xff] %vm439_vm0, %v480_v35 }
 0x119   :  { %v437_v15 = vpop.f32.mrf.mxu0  ;;  %v771_v60 = vld [vmem:[#allocation2] sm:$0xff] }
 0x11a   :  { %v1282_v15 = vld [vmem:[%s2173_s5 + $0x18] sm:$0xff] }
 0x11b   :  { %1090 = vmatpush.bf16.msra.mxu2 %v1282_v15 }
 0x11c   :  { %v458_v9 = vpop.f32.mrf.mxu1 }
 0x11d   :  { %462 = vst.msk [vmem:[#allocation2 + $0x8] sm:$0xff] %vm439_vm0, %v458_v9 }
 0x11e   :  { %v482_v61 = vpop.f32.mrf.mxu2  ;;  %v502_v22 = vpop.f32.mrf.mxu3  ;;  %v773_v2 = vld [vmem:[#allocation2 + $0x10] sm:$0xff] }
 0x11f   :  { %506 = vst.msk [vmem:[#allocation2 + $0x18] sm:$0xff] %vm439_vm0, %v502_v22  ;;  %v1281_v61 = vld [vmem:[%s2173_s5 + $0x10] sm:$0xff] }
 0x120   :  { %1091 = vmatpush.bf16.msra.mxu2 %v1281_v61 }
 0x121   :  { %v524_v28 = vpop.f32.mrf.mxu0 }
 0x122   :  { %528 = vst.msk [vmem:[#allocation2 + $0x20] sm:$0xff] %vm439_vm0, %v524_v28 }
 0x124   :  { %v460_v50 = vpop.f32.mrf.mxu1  ;;  %v772_v43 = vld [vmem:[#allocation2 + $0x8] sm:$0xff]  ;;  %1247 = vmatmul.msk.bf16.gmra.mxu1 %vm439_vm0, %v413_v36  ;;  %1092 = vmatpush.bf16.msra.mxu2 %v1280_v57 }
 0x125   :  { %v787_v8 = vpack.c.bf16 %v772_v43, %v771_v60 }
 0x126   :  { %v504_v19 = vpop.f32.mrf.mxu3  ;;  %v774_v21 = vld [vmem:[#allocation2 + $0x18] sm:$0xff] }
 0x127   :  { %1227 = vmatmul.msk.bf16.vlgmr.msra.gmra.mxu0 %vm439_vm0, %v787_v8  ;;  %v788_v52 = vpack.c.bf16 %v774_v21, %v773_v2 }
 0x128   :  { %1093 = vmatpush.bf16.msra.mxu2 %v1279_v49 }
 0x129   :  { %v526_v23 = vpop.f32.mrf.mxu0  ;;  %v775_v38 = vld [vmem:[#allocation2 + $0x20] sm:$0xff] }
 0x12b   :  { %v568_v51 = vpop.f32.mrf.mxu2 }
 0x12c   :  { %572 = vst.msk [vmem:[#allocation2 + $0x30] sm:$0xff] %vm439_vm0, %v568_v51 }
 0x131   :  { %v546_v16 = vpop.f32.mrf.mxu1 }
 0x132   :  { %550 = vst.msk [vmem:[#allocation2 + $0x28] sm:$0xff] %vm439_vm0, %v546_v16 }
 0x133   :  { %v570_v1 = vpop.f32.mrf.mxu2  ;;  %v777_v26 = vld [vmem:[#allocation2 + $0x30] sm:$0xff] }
 0x134   :  { %1248 = vmatmul.msk.bf16.gmra.mxu1 %vm439_vm0, %v414_v54 }
 0x137   :  { %1228 = vmatmul.msk.bf16.gmra.mxu0 %vm439_vm0, %v788_v52 }
 0x138   :  { %v612_v33 = vpop.f32.mrf.mxu0 }
 0x139   :  { %v548_v31 = vpop.f32.mrf.mxu1  ;;  %616 = vst.msk [vmem:[#allocation2 + $0x40] sm:$0xff] %vm439_vm0, %v612_v33  ;;  %v776_v7 = vld [vmem:[#allocation2 + $0x28] sm:$0xff] }
 0x13a   :  { %v590_v18 = vpop.f32.mrf.mxu3  ;;  %v789_v53 = vpack.c.bf16 %v776_v7, %v775_v38 }
 0x13b   :  { %594 = vst.msk [vmem:[#allocation2 + $0x38] sm:$0xff] %vm439_vm0, %v590_v18 }
 0x13e   :  { %v656_v59 = vpop.f32.mrf.mxu2 }
 0x13f   :  { %660 = vst.msk [vmem:[#allocation2 + $0x50] sm:$0xff] %vm439_vm0, %v656_v59 }
 0x140   :  { %v614_v24 = vpop.f32.mrf.mxu0  ;;  %v779_v58 = vld [vmem:[#allocation2 + $0x40] sm:$0xff] }
 0x141   :  { %v634_v6 = vpop.f32.mrf.mxu1 }
 0x142   :  { %v592_v63 = vpop.f32.mrf.mxu3  ;;  %638 = vst.msk [vmem:[#allocation2 + $0x48] sm:$0xff] %vm439_vm0, %v634_v6  ;;  %v778_v46 = vld [vmem:[#allocation2 + $0x38] sm:$0xff] }
 0x143   :  { %v790_v13 = vpack.c.bf16 %v778_v46, %v777_v26 }
 0x146   :  { %v658_v3 = vpop.f32.mrf.mxu2  ;;  %v781_v35 = vld [vmem:[#allocation2 + $0x50] sm:$0xff] }
 0x147   :  { %1229 = vmatmul.msk.bf16.gmra.mxu0 %vm439_vm0, %v789_v53 }
 0x148   :  { %v700_v48 = vpop.f32.mrf.mxu0 }
 0x149   :  { %v636_v47 = vpop.f32.mrf.mxu1  ;;  %704 = vst.msk [vmem:[#allocation2 + $0x60] sm:$0xff] %vm439_vm0, %v700_v48  ;;  %v780_v55 = vld [vmem:[#allocation2 + $0x48] sm:$0xff] }
 0x14a   :  { %v678_v32 = vpop.f32.mrf.mxu3  ;;  %v791_v45 = vpack.c.bf16 %v780_v55, %v779_v58 }
 0x14b   :  { %682 = vst.msk [vmem:[#allocation2 + $0x58] sm:$0xff] %vm439_vm0, %v678_v32 }
 0x14e   :  { %v744_v10 = vpop.f32.mrf.mxu2 }
 0x14f   :  { %748 = vst.msk [vmem:[#allocation2 + $0x70] sm:$0xff] %vm439_vm0, %v744_v10 }
 0x150   :  { %v702_v44 = vpop.f32.mrf.mxu0  ;;  %v783_v4 = vld [vmem:[#allocation2 + $0x60] sm:$0xff] }
 0x151   :  { %v722_v5 = vpop.f32.mrf.mxu1 }
 0x152   :  { %v680_v37 = vpop.f32.mrf.mxu3  ;;  %726 = vst.msk [vmem:[#allocation2 + $0x68] sm:$0xff] %vm439_vm0, %v722_v5  ;;  %v782_v34 = vld [vmem:[#allocation2 + $0x58] sm:$0xff] }
 0x153   :  { %v792_v27 = vpack.c.bf16 %v782_v34, %v781_v35 }
 0x156   :  { %v746_v56 = vpop.f32.mrf.mxu2  ;;  %v785_v0 = vld [vmem:[#allocation2 + $0x70] sm:$0xff] }
 0x157   :  { %1230 = vmatmul.msk.bf16.gmra.mxu0 %vm439_vm0, %v790_v13 }
 0x159   :  { %v724_v40 = vpop.f32.mrf.mxu1  ;;  %v784_v39 = vld [vmem:[#allocation2 + $0x68] sm:$0xff] }
 0x15a   :  { %v766_v62 = vpop.f32.mrf.mxu3  ;;  %v793_v11 = vpack.c.bf16 %v784_v39, %v783_v4 }
 0x15b   :  { %770 = vst.msk [vmem:[#allocation2 + $0x78] sm:$0xff] %vm439_vm0, %v766_v62 }
 0x15c   :  { %1233 = vmatmul.msk.bf16.vlgmr.msra.gmra.mxu3 %vm439_vm0, %v793_v11 }
 0x15d   :  { %1287 = vmatpush.bf16.msra.mxu3 %v1282_v15 }
 0x161   :  { %v933_v9 = vpop.f32.mrf.mxu1  ;;  %1288 = vmatpush.bf16.msra.mxu3 %v1281_v61 }
 0x162   :  { %v768_v14 = vpop.f32.mrf.mxu3  ;;  %v786_v20 = vld [vmem:[#allocation2 + $0x78] sm:$0xff] }
 0x163   :  { %v794_v17 = vpack.c.bf16 %v786_v20, %v785_v0 }
 0x165   :  { %1289 = vmatpush.bf16.msra.mxu3 %v1280_v57 }
 0x167   :  { %1231 = vmatmul.msk.bf16.gmra.mxu0 %vm439_vm0, %v791_v45 }
 0x169   :  { %v935_v30 = vpop.f32.mrf.mxu1  ;;  %1290 = vmatpush.bf16.msra.mxu3 %v1279_v49 }
 0x16c   :  { %1234 = vmatmul.msk.bf16.gmra.mxu3 %vm439_vm0, %v794_v17 }
 0x177   :  { %1232 = vmatmul.msk.bf16.gmra.mxu0 %vm439_vm0, %v792_v27 }
 0x17c   :  { %1249 = vmatmul.msk.bf16.vlgmr.msrb.gmra.mxu3 %vm439_vm0, %v415_v41  ;;  %v938_v41 = vpop.f32.mrf.mxu1 }
 0x184   :  { %v940_v28 = vpop.f32.mrf.mxu1 }
 0x18c   :  { %1250 = vmatmul.msk.bf16.gmra.mxu3 %vm439_vm0, %v416_v25  ;;  %v943_v16 = vpop.f32.mrf.mxu1 }
 0x194   :  { %v945_v33 = vpop.f32.mrf.mxu1 }
 0x19c   :  { %v948_v6 = vpop.f32.mrf.mxu1 }
 0x1a4   :  { %v848_v12 = vpop.f32.mrf.mxu0  ;;  %v950_v36 = vpop.f32.mrf.mxu1 }
 0x1a5   :  { %v934_v22 = vadd.f32 %v933_v9, %v848_v12 }
 0x1a7   :  { %v989_v60 = vmul.f32 0.01, %v934_v22  ;;  %vm973_vm7 = vcmp.ge.f32.partialorder %v934_v22, 0.0 }
 0x1a9   :  { %v1005_v19 = vsel %vm973_vm7, %v934_v22, %v989_v60 }
 0x1ac   :  { %v850_v50 = vpop.f32.mrf.mxu0  ;;  %v953_v37 = vpop.f32.mrf.mxu1 }
 0x1ad   :  { %v936_v43 = vadd.f32 %v935_v30, %v850_v50 }
 0x1af   :  { %vm974_vm5 = vcmp.ge.f32.partialorder %v936_v43, 0.0  ;;  %v990_v8 = vmul.f32 0.01, %v936_v43 }
 0x1b1   :  { %v1006_v23 = vsel %vm974_vm5, %v936_v43, %v990_v8 }
 0x1b2   :  { %v1021_v29 = vpack.c.bf16 %v1006_v23, %v1005_v19 }
 0x1b4   :  { %v853_v51 = vpop.f32.mrf.mxu0  ;;  %1267 = vmatmul.msk.bf16.vlgmr.msra.gmra.mxu2 %vm1061_vm9, %v1021_v29  ;;  %v955_v54 = vpop.f32.mrf.mxu1 }
 0x1b5   :  { %v939_v1 = vadd.f32 %v938_v41, %v853_v51 }
 0x1b7   :  { %v991_v2 = vmul.f32 0.01, %v939_v1  ;;  %vm975_vm8 = vcmp.ge.f32.partialorder %v939_v1, 0.0 }
 0x1b9   :  { %v1007_v18 = vsel %vm975_vm8, %v939_v1, %v991_v2 }
 0x1bc   :  { %v855_v21 = vpop.f32.mrf.mxu0  ;;  %v958_v17 = vpop.f32.mrf.mxu1 }
 0x1bd   :  { %v941_v52 = vadd.f32 %v940_v28, %v855_v21 }
 0x1bf   :  { %vm976_vm4 = vcmp.ge.f32.partialorder %v941_v52, 0.0  ;;  %v992_v31 = vmul.f32 0.01, %v941_v52 }
 0x1c1   :  { %v1008_v42 = vsel %vm976_vm4, %v941_v52, %v992_v31 }
 0x1c2   :  { %v1022_v59 = vpack.c.bf16 %v1008_v42, %v1007_v18 }
 0x1c4   :  { %v858_v24 = vpop.f32.mrf.mxu0  ;;  %1268 = vmatmul.msk.bf16.gmra.mxu2 %vm1061_vm9, %v1022_v59  ;;  %v960_v9 = vpop.f32.mrf.mxu1 }
 0x1c5   :  { %v944_v63 = vadd.f32 %v943_v16, %v858_v24 }
 0x1c7   :  { %v993_v3 = vmul.f32 0.01, %v944_v63  ;;  %vm977_vm10 = vcmp.ge.f32.partialorder %v944_v63, 0.0 }
 0x1c9   :  { %v1009_v48 = vsel %vm977_vm10, %v944_v63, %v993_v3 }
 0x1cc   :  { %v860_v7 = vpop.f32.mrf.mxu0 }
 0x1cd   :  { %v946_v38 = vadd.f32 %v945_v33, %v860_v7 }
 0x1cf   :  { %vm978_vm11 = vcmp.ge.f32.partialorder %v946_v38, 0.0  ;;  %v994_v53 = vmul.f32 0.01, %v946_v38 }
 0x1d1   :  { %v1010_v47 = vsel %vm978_vm11, %v946_v38, %v994_v53 }
 0x1d2   :  { %v1023_v32 = vpack.c.bf16 %v1010_v47, %v1009_v48 }
 0x1d4   :  { %v863_v10 = vpop.f32.mrf.mxu0  ;;  %1269 = vmatmul.msk.bf16.gmra.mxu2 %vm1061_vm9, %v1023_v32 }
 0x1d5   :  { %v949_v44 = vadd.f32 %v948_v6, %v863_v10 }
 0x1d7   :  { %v995_v46 = vmul.f32 0.01, %v949_v44  ;;  %vm979_vm13 = vcmp.ge.f32.partialorder %v949_v44, 0.0 }
 0x1d9   :  { %v1011_v40 = vsel %vm979_vm13, %v949_v44, %v995_v46 }
 0x1dc   :  { %v865_v5 = vpop.f32.mrf.mxu0 }
 0x1dd   :  { %v951_v26 = vadd.f32 %v950_v36, %v865_v5 }
 0x1df   :  { %v878_v56 = vpop.f32.mrf.mxu3  ;;  %vm980_vm14 = vcmp.ge.f32.partialorder %v951_v26, 0.0  ;;  %v996_v13 = vmul.f32 0.01, %v951_v26 }
 0x1e1   :  { %v1012_v4 = vsel %vm980_vm14, %v951_v26, %v996_v13 }
 0x1e2   :  { %v1024_v39 = vpack.c.bf16 %v1012_v4, %v1011_v40 }
 0x1e4   :  { %v868_v62 = vpop.f32.mrf.mxu0  ;;  %1270 = vmatmul.msk.bf16.gmra.mxu2 %vm1061_vm9, %v1024_v39 }
 0x1e5   :  { %v954_v14 = vadd.f32 %v953_v37, %v868_v62 }
 0x1e7   :  { %v880_v11 = vpop.f32.mrf.mxu3  ;;  %v997_v58 = vmul.f32 0.01, %v954_v14  ;;  %vm981_vm1 = vcmp.ge.f32.partialorder %v954_v14, 0.0 }
 0x1e9   :  { %v1013_v34 = vsel %vm981_vm1, %v954_v14, %v997_v58 }
 0x1ec   :  { %v870_v55 = vpop.f32.mrf.mxu0 }
 0x1ed   :  { %v956_v20 = vadd.f32 %v955_v54, %v870_v55 }
 0x1ef   :  { %v883_v45 = vpop.f32.mrf.mxu3  ;;  %vm982_vm15 = vcmp.ge.f32.partialorder %v956_v20, 0.0  ;;  %v998_v0 = vmul.f32 0.01, %v956_v20 }
 0x1f1   :  { %v1014_v35 = vsel %vm982_vm15, %v956_v20, %v998_v0 }
 0x1f2   :  { %v1025_v27 = vpack.c.bf16 %v1014_v35, %v1013_v34 }
 0x1f4   :  { %v873_v25 = vpop.f32.mrf.mxu0  ;;  %1271 = vmatmul.msk.bf16.gmra.mxu2 %vm1061_vm9, %v1025_v27 }
 0x1f5   :  { %v959_v61 = vadd.f32 %v958_v17, %v873_v25 }
 0x1f7   :  { %v885_v15 = vpop.f32.mrf.mxu3  ;;  %v999_v49 = vmul.f32 0.01, %v959_v61  ;;  %vm983_vm2 = vcmp.ge.f32.partialorder %v959_v61, 0.0 }
 0x1f9   :  { %v1015_v22 = vsel %vm983_vm2, %v959_v61, %v999_v49 }
 0x1fc   :  { %v875_v57 = vpop.f32.mrf.mxu0 }
 0x1fd   :  { %v961_v41 = vadd.f32 %v960_v9, %v875_v57 }
 0x1ff   :  { %v963_v30 = vpop.f32.mrf.mxu3  ;;  %vm984_vm3 = vcmp.ge.f32.partialorder %v961_v41, 0.0  ;;  %v1000_v12 = vmul.f32 0.01, %v961_v41 }
 0x200   :  { %v964_v50 = vadd.f32 %v963_v30, %v878_v56 }
 0x201   :  { %v1016_v28 = vsel %vm984_vm3, %v961_v41, %v1000_v12 }
 0x202   :  { %v1026_v60 = vpack.c.bf16 %v1016_v28, %v1015_v22  ;;  %v1001_v8 = vmul.f32 0.01, %v964_v50  ;;  %vm985_vm12 = vcmp.ge.f32.partialorder %v964_v50, 0.0 }
 0x204   :  { %1272 = vmatmul.msk.bf16.gmra.mxu2 %vm1061_vm9, %v1026_v60  ;;  %v1017_v29 = vsel %vm985_vm12, %v964_v50, %v1001_v8 }
 0x207   :  { %v965_v43 = vpop.f32.mrf.mxu3 }
 0x208   :  { %v966_v19 = vadd.f32 %v965_v43, %v880_v11 }
 0x20a   :  { %vm986_vm6 = vcmp.ge.f32.partialorder %v966_v19, 0.0  ;;  %v1002_v23 = vmul.f32 0.01, %v966_v19 }
 0x20c   :  { %v1018_v51 = vsel %vm986_vm6, %v966_v19, %v1002_v23 }
 0x20d   :  { %v1027_v16 = vpack.c.bf16 %v1018_v51, %v1017_v29 }
 0x20f   :  { %v968_v1 = vpop.f32.mrf.mxu3  ;;  %1273 = vmatmul.msk.bf16.vlgmr.msra.gmra.mxu3 %vm1061_vm9, %v1027_v16 }
 0x210   :  { %v969_v21 = vadd.f32 %v968_v1, %v883_v45 }
 0x212   :  { %v1003_v52 = vmul.f32 0.01, %v969_v21  ;;  %vm987_vm7 = vcmp.ge.f32.partialorder %v969_v21, 0.0 }
 0x214   :  { %v1019_v18 = vsel %vm987_vm7, %v969_v21, %v1003_v52 }
 0x217   :  { %v970_v2 = vpop.f32.mrf.mxu3 }
 0x218   :  { %v971_v33 = vadd.f32 %v970_v2, %v885_v15 }
 0x21a   :  { %vm988_vm5 = vcmp.ge.f32.partialorder %v971_v33, 0.0  ;;  %v1004_v31 = vmul.f32 0.01, %v971_v33 }
 0x21c   :  { %v1020_v42 = vsel %vm988_vm5, %v971_v33, %v1004_v31 }
 0x21d   :  { %v1028_v59 = vpack.c.bf16 %v1020_v42, %v1019_v18 }
 0x21f   :  { %1274 = vmatmul.msk.bf16.gmra.mxu3 %vm1061_vm9, %v1028_v59 }
 0x237   :  { %v1095_v24 = vpop.f32.mrf.mxu2 }
 0x238   :  { %vm1135_vm8 = vcmp.ge.f32.partialorder %v1095_v24, 0.0  ;;  %v1151_v6 = vmul.f32 0.01, %v1095_v24 }
 0x23a   :  { %v1167_v63 = vsel %vm1135_vm8, %v1095_v24, %v1151_v6 }
 0x23b   :  { %1183 = vst.msk [vmem:[%s2174_s6] sm:$0xff] %vm439_vm0, %v1167_v63 }
 0x23f   :  { %v1097_v7 = vpop.f32.mrf.mxu2 }
 0x240   :  { %vm1136_vm4 = vcmp.ge.f32.partialorder %v1097_v7, 0.0  ;;  %v1152_v3 = vmul.f32 0.01, %v1097_v7 }
 0x242   :  { %v1168_v38 = vsel %vm1136_vm4, %v1097_v7, %v1152_v3 }
 0x243   :  { %1184 = vst.msk [vmem:[%s2174_s6 + $0x8] sm:$0xff] %vm439_vm0, %v1168_v38 }
 0x247   :  { %v1100_v53 = vpop.f32.mrf.mxu2 }
 0x248   :  { %vm1137_vm9 = vcmp.ge.f32.partialorder %v1100_v53, 0.0  ;;  %v1153_v48 = vmul.f32 0.01, %v1100_v53 }
 0x24a   :  { %v1169_v47 = vsel %vm1137_vm9, %v1100_v53, %v1153_v48 }
 0x24b   :  { %1185 = vst.msk [vmem:[%s2174_s6 + $0x10] sm:$0xff] %vm439_vm0, %v1169_v47 }
 0x24f   :  { %v1102_v32 = vpop.f32.mrf.mxu2 }
 0x250   :  { %vm1138_vm10 = vcmp.ge.f32.partialorder %v1102_v32, 0.0  ;;  %v1154_v36 = vmul.f32 0.01, %v1102_v32 }
 0x252   :  { %v1170_v10 = vsel %vm1138_vm10, %v1102_v32, %v1154_v36 }
 0x253   :  { %1186 = vst.msk [vmem:[%s2174_s6 + $0x18] sm:$0xff] %vm439_vm0, %v1170_v10 }
 0x257   :  { %v1105_v44 = vpop.f32.mrf.mxu2 }
 0x258   :  { %vm1139_vm11 = vcmp.ge.f32.partialorder %v1105_v44, 0.0  ;;  %v1155_v5 = vmul.f32 0.01, %v1105_v44 }
 0x25a   :  { %v1171_v37 = vsel %vm1139_vm11, %v1105_v44, %v1155_v5 }
 0x25b   :  { %1187 = vst.msk [vmem:[%s2174_s6 + $0x20] sm:$0xff] %vm439_vm0, %v1171_v37 }
 0x25f   :  { %v1107_v46 = vpop.f32.mrf.mxu2 }
 0x260   :  { %vm1140_vm13 = vcmp.ge.f32.partialorder %v1107_v46, 0.0  ;;  %v1156_v56 = vmul.f32 0.01, %v1107_v46 }
 0x262   :  { %v1172_v26 = vsel %vm1140_vm13, %v1107_v46, %v1156_v56 }
 0x263   :  { %1188 = vst.msk [vmem:[%s2174_s6 + $0x28] sm:$0xff] %vm439_vm0, %v1172_v26 }
 0x267   :  { %v1110_v13 = vpop.f32.mrf.mxu2 }
 0x268   :  { %vm1141_vm14 = vcmp.ge.f32.partialorder %v1110_v13, 0.0  ;;  %v1157_v40 = vmul.f32 0.01, %v1110_v13 }
 0x26a   :  { %v1173_v4 = vsel %vm1141_vm14, %v1110_v13, %v1157_v40 }
 0x26b   :  { %1189 = vst.msk [vmem:[%s2174_s6 + $0x30] sm:$0xff] %vm439_vm0, %v1173_v4 }
 0x26f   :  { %v1112_v39 = vpop.f32.mrf.mxu2 }
 0x270   :  { %vm1142_vm1 = vcmp.ge.f32.partialorder %v1112_v39, 0.0  ;;  %v1158_v62 = vmul.f32 0.01, %v1112_v39 }
 0x272   :  { %v1174_v11 = vsel %vm1142_vm1, %v1112_v39, %v1158_v62 }
 0x273   :  { %1190 = vst.msk [vmem:[%s2174_s6 + $0x38] sm:$0xff] %vm439_vm0, %v1174_v11 }
 0x277   :  { %v1115_v54 = vpop.f32.mrf.mxu2 }
 0x278   :  { %vm1143_vm15 = vcmp.ge.f32.partialorder %v1115_v54, 0.0  ;;  %v1159_v14 = vmul.f32 0.01, %v1115_v54 }
 0x27a   :  { %v1175_v55 = vsel %vm1143_vm15, %v1115_v54, %v1159_v14 }
 0x27b   :  { %1191 = vst.msk [vmem:[%s2174_s6 + $0x40] sm:$0xff] %vm439_vm0, %v1175_v55 }
 0x27f   :  { %v1117_v58 = vpop.f32.mrf.mxu2 }
 0x280   :  { %vm1144_vm2 = vcmp.ge.f32.partialorder %v1117_v58, 0.0  ;;  %v1160_v45 = vmul.f32 0.01, %v1117_v58 }
 0x282   :  { %v1176_v20 = vsel %vm1144_vm2, %v1117_v58, %v1160_v45 }
 0x283   :  { %1192 = vst.msk [vmem:[%s2174_s6 + $0x48] sm:$0xff] %vm439_vm0, %v1176_v20 }
 0x287   :  { %v1120_v0 = vpop.f32.mrf.mxu2 }
 0x288   :  { %vm1145_vm3 = vcmp.ge.f32.partialorder %v1120_v0, 0.0  ;;  %v1161_v17 = vmul.f32 0.01, %v1120_v0 }
 0x28a   :  { %v1177_v34 = vsel %vm1145_vm3, %v1120_v0, %v1161_v17 }
 0x28b   :  { %1193 = vst.msk [vmem:[%s2174_s6 + $0x50] sm:$0xff] %vm439_vm0, %v1177_v34 }
 0x28f   :  { %v1122_v35 = vpop.f32.mrf.mxu2 }
 0x290   :  { %vm1146_vm12 = vcmp.ge.f32.partialorder %v1122_v35, 0.0  ;;  %v1162_v25 = vmul.f32 0.01, %v1122_v35 }
 0x292   :  { %v1125_v27 = vpop.f32.mrf.mxu3  ;;  %v1178_v61 = vsel %vm1146_vm12, %v1122_v35, %v1162_v25 }
 0x293   :  { %vm1147_vm6 = vcmp.ge.f32.partialorder %v1125_v27, 0.0  ;;  %v1163_v15 = vmul.f32 0.01, %v1125_v27  ;;  %1194 = vst.msk [vmem:[%s2174_s6 + $0x58] sm:$0xff] %vm439_vm0, %v1178_v61 }
 0x295   :  { %v1179_v9 = vsel %vm1147_vm6, %v1125_v27, %v1163_v15 }
 0x296   :  { %1195 = vst.msk [vmem:[%s2174_s6 + $0x60] sm:$0xff] %vm439_vm0, %v1179_v9 }
 0x29a   :  { %v1127_v57 = vpop.f32.mrf.mxu3 }
 0x29b   :  { %vm1148_vm7 = vcmp.ge.f32.partialorder %v1127_v57, 0.0  ;;  %v1164_v49 = vmul.f32 0.01, %v1127_v57 }
 0x29d   :  { %v1180_v30 = vsel %vm1148_vm7, %v1127_v57, %v1164_v49 }
 0x29e   :  { %1196 = vst.msk [vmem:[%s2174_s6 + $0x68] sm:$0xff] %vm439_vm0, %v1180_v30 }
 0x2a2   :  { %v1130_v41 = vpop.f32.mrf.mxu3 }
 0x2a3   :  { %vm1149_vm5 = vcmp.ge.f32.partialorder %v1130_v41, 0.0  ;;  %v1165_v12 = vmul.f32 0.01, %v1130_v41 }
 0x2a5   :  { %v1181_v22 = vsel %vm1149_vm5, %v1130_v41, %v1165_v12 }
 0x2a6   :  { %1197 = vst.msk [vmem:[%s2174_s6 + $0x70] sm:$0xff] %vm439_vm0, %v1181_v22 }
 0x2aa   :  { %v1132_v28 = vpop.f32.mrf.mxu3 }
 0x2ab   :  { %vm1150_vm8 = vcmp.ge.f32.partialorder %v1132_v28, 0.0  ;;  %v1166_v50 = vmul.f32 0.01, %v1132_v28 }
 0x2ad   :  { %v1182_v60 = vsel %vm1150_vm8, %v1132_v28, %v1166_v50 }
 0x2ae   :  { %1198 = vst.msk [vmem:[%s2174_s6 + $0x78] sm:$0xff] %vm439_vm0, %v1182_v60 }

</bundles_post_ra>
